<compile_context>
chip_gen: v5e
topology: v5e:2x2
jax: 0.10.0
libtpu: 0.0.40
codegen_flags: <defaults>
</compile_context>

<pallas_src>
import math
import numpy as np

import jax
import jax.numpy as jnp
from jax import lax
from jax.experimental import pallas as pl
from jax.experimental.pallas import tpu as pltpu

_F32 = jnp.float32


# ----------------------------------- Pallas kernel --------------------------------------
def _camera_pose_kernel(in_ref, out_ref):
    # packed input slab (16,4):
    #   rows  0: 3  = S   (start_pose_w2c)
    #   rows  4: 7  = S^T (pre-transposed on host, free glue)
    #   rows  8:11  = P^T (projection matrix transposed)
    #   row  12     = [w0, w1, w2, 0]
    #   row  13     = [v0, v1, v2, 0]
    S = in_ref[0:4, :]
    ST = in_ref[4:8, :]
    PT = in_ref[8:12, :]
    wv = in_ref[12:13, :]          # (1,4)
    vv = in_ref[13:14, :]          # (1,4)

    r = lax.broadcasted_iota(jnp.int32, (4, 4), 0)
    c = lax.broadcasted_iota(jnp.int32, (4, 4), 1)
    I3 = ((r == c) & (r < 3)).astype(_F32)            # 3x3 identity embedded in 4x4
    M3 = ((r < 3) & (c < 3)).astype(_F32)             # 3x3-block mask

    def oh(i, j):                                     # one-hot basis matrix E_ij
        return ((r == i) & (c == j)).astype(_F32)

    def matmul4(A, B):                                # 4x4 @ 4x4 as 4 rank-1 VPU updates
        out = A[:, 0:1] * B[0:1, :]
        for k in range(1, 4):
            out = out + A[:, k:k + 1] * B[k:k + 1, :]
        return out

    def rowmul(rv, B):                                # (1,4) @ 4x4 on the VPU
        out = rv[:, 0:1] * B[0:1, :]
        for k in range(1, 4):
            out = out + rv[:, k:k + 1] * B[k:k + 1, :]
        return out

    # ---- se3_to_SE3(w, v): exp map via fused Taylor series ----
    w0, w1, w2 = wv[:, 0:1], wv[:, 1:2], wv[:, 2:3]

    wx = ((-w2) * oh(0, 1) + w1 * oh(0, 2) + w2 * oh(1, 0)
          + (-w0) * oh(1, 2) + (-w1) * oh(2, 0) + w0 * oh(2, 1))   # skew(w), embedded 4x4
    wx2 = matmul4(wx, wx)                                          # symmetric

    x2 = w0 * w0 + w1 * w1 + w2 * w2                               # theta^2, (1,1), no reduce

    # A = sin(x)/x, B = (1-cos x)/x^2, C = (x - sin x)/x^3 as one fused series in x^2
    def fused_taylor(x2, nth=10):
        A = jnp.zeros_like(x2)
        B = jnp.zeros_like(x2)
        C = jnp.zeros_like(x2)
        dA = dB = dC = 1.0
        pw = jnp.ones_like(x2)
        for i in range(nth + 1):
            if i > 0:
                dA *= (2 * i) * (2 * i + 1)
                pw = pw * x2
            dB *= (2 * i + 1) * (2 * i + 2)
            dC *= (2 * i + 2) * (2 * i + 3)
            sgn = (-1.0) ** i
            A = A + (sgn / dA) * pw
            B = B + (sgn / dB) * pw
            C = C + (sgn / dC) * pw
        return A, B, C

    A, B, C = fused_taylor(x2)

    R = I3 + A * wx + B * wx2          # rotation of deltaT
    RT = I3 - A * wx + B * wx2         # its transpose (wx skew, wx2 symmetric)
    V = I3 + B * wx + C * wx2
    VT = I3 - B * wx + C * wx2

    v0, v1, v2 = vv[:, 0:1], vv[:, 1:2], vv[:, 2:3]
    ve_col = v0 * oh(0, 3) + v1 * oh(1, 3) + v2 * oh(2, 3)     # v as column 3
    ve_row = v0 * oh(3, 0) + v1 * oh(3, 1) + v2 * oh(3, 2)     # v as row 3

    # ---- pose_w2c = inv(deltaT @ inv(S)) == S @ inv(deltaT), rigid closed-form inverse ----
    m_col = matmul4(V, ve_col)                         # column 3 = V @ v
    inv_dT = RT - matmul4(RT, m_col) + oh(3, 3)        # [[R^T, -R^T(Vv)],[0,0,0,1]]
    pose_w2c = matmul4(S, inv_dT)

    # ---- world_view = pose_w2c^T = inv(deltaT)^T @ S^T (transpose-free) ----
    m_row = matmul4(ve_row, VT)                        # row 3 = (V v)^T
    inv_dT_T = R - matmul4(m_row, R) + oh(3, 3)        # [[R, 0],[-(Vv)^T R, 1]]
    W = matmul4(inv_dT_T, ST)

    # ---- full_proj = world_view @ P^T ----
    full_proj = matmul4(W, PT)

    # ---- camera_center = inv(W)[3,:3] = -t_p^T @ Rs @ R^T  (rigid pose, no inverse) ----
    tp_row = W[3:4, :]                                 # [t_p^T, 1]
    cc_row = -rowmul(rowmul(tp_row, S * M3), RT)       # (1,4), col 3 == 0

    # packed output slab (16,4): rows 0:3 pose, 4:7 world_view, 8:11 full_proj, 12 cam_center
    out_ref[0:4, :] = pose_w2c
    out_ref[4:8, :] = W
    out_ref[8:12, :] = full_proj
    out_ref[12:13, :] = cc_row
    out_ref[13:16, :] = jnp.zeros((3, 4), _F32)


@jax.jit
def _camera_pose_forward(w, v, start_pose_w2c, projT):
    S = start_pose_w2c.astype(_F32)
    slab = jnp.zeros((16, 4), _F32)
    slab = slab.at[0:4, :].set(S)
    slab = slab.at[4:8, :].set(S.T)                    # free host glue (transpose-free kernel)
    slab = slab.at[8:12, :].set(projT.astype(_F32))
    slab = slab.at[12, 0:3].set(w.reshape(3).astype(_F32))
    slab = slab.at[13, 0:3].set(v.reshape(3).astype(_F32))

    out = pl.pallas_call(
        _camera_pose_kernel,
        out_shape=jax.ShapeDtypeStruct((16, 4), _F32),
        in_specs=[pl.BlockSpec(memory_space=pltpu.MemorySpace.VMEM)],
        out_specs=pl.BlockSpec(memory_space=pltpu.MemorySpace.VMEM),
    )(slab)

    pose = out[0:4, :]
    wvt = out[4:8, :]
    fpt = out[8:12, :]
    cc = out[12, 0:3]
    return pose, wvt, fpt, cc


# --------------------------------------- glue -------------------------------------------
def get_projection_matrix(znear, zfar, fovX, fovY):
    tanHalfFovY = math.tan(fovY / 2)
    tanHalfFovX = math.tan(fovX / 2)
    top = tanHalfFovY * znear
    bottom = -top
    right = tanHalfFovX * znear
    left = -right
    P = np.zeros((4, 4), dtype=np.float32)
    z_sign = 1.0
    P[0, 0] = 2.0 * znear / (right - left)
    P[1, 1] = 2.0 * znear / (top - bottom)
    P[0, 2] = (right + left) / (right - left)
    P[1, 2] = (top + bottom) / (top - bottom)
    P[3, 2] = z_sign
    P[2, 2] = z_sign * zfar / (zfar - znear)
    P[2, 3] = -(zfar * znear) / (zfar - znear)
    return P


class CameraPose:
    """JAX/Pallas port of the PyTorch CameraPose nn.Module (forward + update)."""

    def __init__(self, start_pose_w2c, FoVx, FoVy, image_width, image_height,
                 trans=np.array([0.0, 0.0, 0.0], np.float32), scale=1.0, key=None):
        self.FoVx = FoVx
        self.FoVy = FoVy
        self.image_width = image_width
        self.image_height = image_height
        self.zfar = 3.0
        self.znear = 0.01
        self.trans = trans
        self.scale = scale
        self.cov_offset = 0
        # deterministic stand-in for torch.normal(0, 1e-6, size=(3,))
        if key is None:
            key = jax.random.PRNGKey(0)
        kw, kv = jax.random.split(key)
        self.w = (1e-6 * jax.random.normal(kw, (3,))).astype(jnp.float32)
        self.v = (1e-6 * jax.random.normal(kv, (3,))).astype(jnp.float32)
        self.forward(start_pose_w2c)

    def forward(self, start_pose_w2c):
        # projection matrix construction is pure scalar parameter setup -> host glue
        projT = jnp.asarray(
            get_projection_matrix(self.znear, self.zfar, self.FoVx, self.FoVy).T)
        pose, wvt, fpt, cc = _camera_pose_forward(
            self.w, self.v, jnp.asarray(start_pose_w2c, jnp.float32), projT)
        self.pose_w2c = pose
        self.world_view_transform = wvt
        self.projection_matrix = projT
        self.full_proj_transform = fpt
        self.camera_center = cc
        # TODO(synk): .cuda() device moves in update() are host/device plumbing with no
        # Pallas equivalent.

    def current_campose_c2w(self):
        # TODO(synk): .cpu().detach().numpy() is host-side plumbing; done with numpy here.
        return np.linalg.inv(np.asarray(self.pose_w2c, np.float64))


# ------------------------------- host reference (float64) -------------------------------
def _reference_numpy(w, v, S, P):
    w = np.asarray(w, np.float64)
    v = np.asarray(v, np.float64)
    S = np.asarray(S, np.float64)
    P = np.asarray(P, np.float64)

    def taylor(x, kind, nth=10):
        ans, denom = 0.0, 1.0
        for i in range(nth + 1):
            if kind == "A":
                if i > 0:
                    denom *= (2 * i) * (2 * i + 1)
            elif kind == "B":
                denom *= (2 * i + 1) * (2 * i + 2)
            else:
                denom *= (2 * i + 2) * (2 * i + 3)
            ans += (-1.0) ** i * x ** (2 * i) / denom
        return ans

    wx = np.array([[0.0, -w[2], w[1]], [w[2], 0.0, -w[0]], [-w[1], w[0], 0.0]])
    th = np.linalg.norm(w)
    A, B, C = taylor(th, "A"), taylor(th, "B"), taylor(th, "C")
    R = np.eye(3) + A * wx + B * (wx @ wx)
    V = np.eye(3) + B * wx + C * (wx @ wx)
    deltaT = np.eye(4)
    deltaT[:3, :3] = R
    deltaT[:3, 3] = V @ v
    pose = np.linalg.inv(deltaT @ np.linalg.inv(S))
    W = pose.T
    FPT = W @ P.T
    cc = np.linalg.inv(W)[3, :3]
    return pose, W, FPT, cc


def _check(cam, start, P, tag):
    ref_pose, ref_W, ref_FPT, ref_cc = _reference_numpy(
        np.asarray(cam.w), np.asarray(cam.v), start, P)
    assert np.allclose(np.asarray(cam.pose_w2c), ref_pose, rtol=1e-4, atol=1e-4), tag
    assert np.allclose(np.asarray(cam.world_view_transform), ref_W, rtol=1e-4, atol=1e-4), tag
    assert np.allclose(np.asarray(cam.full_proj_transform), ref_FPT, rtol=1e-4, atol=1e-4), tag
    assert np.allclose(np.asarray(cam.camera_center), ref_cc, rtol=1e-4, atol=1e-4), tag


if __name__ == "__main__":
    # deterministic rigid start pose (w2c): rotation about an axis + translation
    ang = 0.4
    axis = np.array([0.3, -0.5, 0.8])
    axis /= np.linalg.norm(axis)
    K = np.array([[0.0, -axis[2], axis[1]],
                  [axis[2], 0.0, -axis[0]],
                  [-axis[1], axis[0], 0.0]])
    Rm = np.eye(3) + math.sin(ang) * K + (1.0 - math.cos(ang)) * (K @ K)
    start = np.eye(4, dtype=np.float32)
    start[:3, :3] = Rm
    start[:3, 3] = [0.1, -0.2, 0.5]

    FoVx, FoVy = 0.8, 0.6
    cam = CameraPose(jnp.asarray(start), FoVx, FoVy,
                     image_width=16, image_height=16, key=jax.random.PRNGKey(0))
    jax.block_until_ready((cam.pose_w2c, cam.world_view_transform,
                           cam.full_proj_transform, cam.camera_center))

    P = get_projection_matrix(cam.znear, cam.zfar, FoVx, FoVy)
    _check(cam, start, P, "near-identity delta")

    # second check away from identity (exercises the closed-form rigid-inverse algebra)
    cam.w = jnp.array([0.12, -0.23, 0.31], jnp.float32)
    cam.v = jnp.array([-0.05, 0.20, 0.10], jnp.float32)
    cam.forward(jnp.asarray(start))
    jax.block_until_ready((cam.pose_w2c, cam.world_view_transform,
                           cam.full_proj_transform, cam.camera_center))
    _check(cam, start, P, "finite delta")

    print("KERNEL_OK")
</pallas_src>

<mosaic_0001>
module attributes {stable_mosaic.version = 11 : i64} {
  func.func @_camera_pose_kernel(%arg0: memref<16x4xf32, #tpu.memory_space<vmem>>, %arg1: memref<16x4xf32, #tpu.memory_space<vmem>>) attributes {dimension_semantics = [], scalar_prefetch = 0 : i64, scratch_operands = 0 : i64, tpu.core_type = #tpu.core_type<tc>} {
    %c0 = arith.constant 0 : index
    %c0_0 = arith.constant 0 : index
    %0 = vector.load %arg0[%c0, %c0_0] : memref<16x4xf32, #tpu.memory_space<vmem>>, vector<4x4xf32>
    %c4 = arith.constant 4 : index
    %c0_1 = arith.constant 0 : index
    %1 = vector.load %arg0[%c4, %c0_1] : memref<16x4xf32, #tpu.memory_space<vmem>>, vector<4x4xf32>
    %c8 = arith.constant 8 : index
    %c0_2 = arith.constant 0 : index
    %2 = vector.load %arg0[%c8, %c0_2] : memref<16x4xf32, #tpu.memory_space<vmem>>, vector<4x4xf32>
    %c12 = arith.constant 12 : index
    %c0_3 = arith.constant 0 : index
    %3 = vector.load %arg0[%c12, %c0_3] : memref<16x4xf32, #tpu.memory_space<vmem>>, vector<1x4xf32>
    %c13 = arith.constant 13 : index
    %c0_4 = arith.constant 0 : index
    %4 = vector.load %arg0[%c13, %c0_4] : memref<16x4xf32, #tpu.memory_space<vmem>>, vector<1x4xf32>
    %5 = tpu.iota {dimensions = array<i32: 0>} : vector<4x4xi32>
    %6 = tpu.iota {dimensions = array<i32: 1>} : vector<4x4xi32>
    %7 = arith.cmpi eq, %5, %6 : vector<4x4xi32>
    %c3_i32 = arith.constant 3 : i32
    %8 = vector.broadcast %c3_i32 : i32 to vector<4x4xi32>
    %9 = arith.cmpi slt, %5, %8 : vector<4x4xi32>
    %10 = arith.andi %7, %9 : vector<4x4xi1>
    %11 = arith.extui %10 : vector<4x4xi1> to vector<4x4xi32>
    %12 = arith.sitofp %11 : vector<4x4xi32> to vector<4x4xf32>
    %c3_i32_5 = arith.constant 3 : i32
    %13 = vector.broadcast %c3_i32_5 : i32 to vector<4x4xi32>
    %14 = arith.cmpi slt, %5, %13 : vector<4x4xi32>
    %c3_i32_6 = arith.constant 3 : i32
    %15 = vector.broadcast %c3_i32_6 : i32 to vector<4x4xi32>
    %16 = arith.cmpi slt, %6, %15 : vector<4x4xi32>
    %17 = arith.andi %14, %16 : vector<4x4xi1>
    %18 = arith.extui %17 : vector<4x4xi1> to vector<4x4xi32>
    %19 = arith.sitofp %18 : vector<4x4xi32> to vector<4x4xf32>
    %20 = vector.extract_strided_slice %3 {offsets = [0, 0], sizes = [1, 1], strides = [1, 1]} : vector<1x4xf32> to vector<1x1xf32>
    %21 = vector.extract_strided_slice %3 {offsets = [0, 1], sizes = [1, 1], strides = [1, 1]} : vector<1x4xf32> to vector<1x1xf32>
    %22 = vector.extract_strided_slice %3 {offsets = [0, 2], sizes = [1, 1], strides = [1, 1]} : vector<1x4xf32> to vector<1x1xf32>
    %cst = arith.constant 0.000000e+00 : f32
    %23 = vector.broadcast %cst : f32 to vector<1x1xf32>
    %24 = arith.subf %23, %22 : vector<1x1xf32>
    %c0_i32 = arith.constant 0 : i32
    %25 = vector.broadcast %c0_i32 : i32 to vector<4x4xi32>
    %26 = arith.cmpi eq, %5, %25 : vector<4x4xi32>
    %c1_i32 = arith.constant 1 : i32
    %27 = vector.broadcast %c1_i32 : i32 to vector<4x4xi32>
    %28 = arith.cmpi eq, %6, %27 : vector<4x4xi32>
    %29 = arith.andi %26, %28 : vector<4x4xi1>
    %30 = arith.extui %29 : vector<4x4xi1> to vector<4x4xi32>
    %31 = arith.sitofp %30 : vector<4x4xi32> to vector<4x4xf32>
    %32 = vector.broadcast %24 : vector<1x1xf32> to vector<4x4xf32>
    %33 = arith.mulf %32, %31 : vector<4x4xf32>
    %c0_i32_7 = arith.constant 0 : i32
    %34 = vector.broadcast %c0_i32_7 : i32 to vector<4x4xi32>
    %35 = arith.cmpi eq, %5, %34 : vector<4x4xi32>
    %c2_i32 = arith.constant 2 : i32
    %36 = vector.broadcast %c2_i32 : i32 to vector<4x4xi32>
    %37 = arith.cmpi eq, %6, %36 : vector<4x4xi32>
    %38 = arith.andi %35, %37 : vector<4x4xi1>
    %39 = arith.extui %38 : vector<4x4xi1> to vector<4x4xi32>
    %40 = arith.sitofp %39 : vector<4x4xi32> to vector<4x4xf32>
    %41 = vector.broadcast %21 : vector<1x1xf32> to vector<4x4xf32>
    %42 = arith.mulf %41, %40 : vector<4x4xf32>
    %43 = arith.addf %33, %42 : vector<4x4xf32>
    %c1_i32_8 = arith.constant 1 : i32
    %44 = vector.broadcast %c1_i32_8 : i32 to vector<4x4xi32>
    %45 = arith.cmpi eq, %5, %44 : vector<4x4xi32>
    %c0_i32_9 = arith.constant 0 : i32
    %46 = vector.broadcast %c0_i32_9 : i32 to vector<4x4xi32>
    %47 = arith.cmpi eq, %6, %46 : vector<4x4xi32>
    %48 = arith.andi %45, %47 : vector<4x4xi1>
    %49 = arith.extui %48 : vector<4x4xi1> to vector<4x4xi32>
    %50 = arith.sitofp %49 : vector<4x4xi32> to vector<4x4xf32>
    %51 = vector.broadcast %22 : vector<1x1xf32> to vector<4x4xf32>
    %52 = arith.mulf %51, %50 : vector<4x4xf32>
    %53 = arith.addf %43, %52 : vector<4x4xf32>
    %cst_10 = arith.constant 0.000000e+00 : f32
    %54 = vector.broadcast %cst_10 : f32 to vector<1x1xf32>
    %55 = arith.subf %54, %20 : vector<1x1xf32>
    %c1_i32_11 = arith.constant 1 : i32
    %56 = vector.broadcast %c1_i32_11 : i32 to vector<4x4xi32>
    %57 = arith.cmpi eq, %5, %56 : vector<4x4xi32>
    %c2_i32_12 = arith.constant 2 : i32
    %58 = vector.broadcast %c2_i32_12 : i32 to vector<4x4xi32>
    %59 = arith.cmpi eq, %6, %58 : vector<4x4xi32>
    %60 = arith.andi %57, %59 : vector<4x4xi1>
    %61 = arith.extui %60 : vector<4x4xi1> to vector<4x4xi32>
    %62 = arith.sitofp %61 : vector<4x4xi32> to vector<4x4xf32>
    %63 = vector.broadcast %55 : vector<1x1xf32> to vector<4x4xf32>
    %64 = arith.mulf %63, %62 : vector<4x4xf32>
    %65 = arith.addf %53, %64 : vector<4x4xf32>
    %cst_13 = arith.constant 0.000000e+00 : f32
    %66 = vector.broadcast %cst_13 : f32 to vector<1x1xf32>
    %67 = arith.subf %66, %21 : vector<1x1xf32>
    %c2_i32_14 = arith.constant 2 : i32
    %68 = vector.broadcast %c2_i32_14 : i32 to vector<4x4xi32>
    %69 = arith.cmpi eq, %5, %68 : vector<4x4xi32>
    %c0_i32_15 = arith.constant 0 : i32
    %70 = vector.broadcast %c0_i32_15 : i32 to vector<4x4xi32>
    %71 = arith.cmpi eq, %6, %70 : vector<4x4xi32>
    %72 = arith.andi %69, %71 : vector<4x4xi1>
    %73 = arith.extui %72 : vector<4x4xi1> to vector<4x4xi32>
    %74 = arith.sitofp %73 : vector<4x4xi32> to vector<4x4xf32>
    %75 = vector.broadcast %67 : vector<1x1xf32> to vector<4x4xf32>
    %76 = arith.mulf %75, %74 : vector<4x4xf32>
    %77 = arith.addf %65, %76 : vector<4x4xf32>
    %c2_i32_16 = arith.constant 2 : i32
    %78 = vector.broadcast %c2_i32_16 : i32 to vector<4x4xi32>
    %79 = arith.cmpi eq, %5, %78 : vector<4x4xi32>
    %c1_i32_17 = arith.constant 1 : i32
    %80 = vector.broadcast %c1_i32_17 : i32 to vector<4x4xi32>
    %81 = arith.cmpi eq, %6, %80 : vector<4x4xi32>
    %82 = arith.andi %79, %81 : vector<4x4xi1>
    %83 = arith.extui %82 : vector<4x4xi1> to vector<4x4xi32>
    %84 = arith.sitofp %83 : vector<4x4xi32> to vector<4x4xf32>
    %85 = vector.broadcast %20 : vector<1x1xf32> to vector<4x4xf32>
    %86 = arith.mulf %85, %84 : vector<4x4xf32>
    %87 = arith.addf %77, %86 : vector<4x4xf32>
    %88 = vector.extract_strided_slice %87 {offsets = [0, 0], sizes = [4, 1], strides = [1, 1]} : vector<4x4xf32> to vector<4x1xf32>
    %89 = vector.extract_strided_slice %87 {offsets = [0, 0], sizes = [1, 4], strides = [1, 1]} : vector<4x4xf32> to vector<1x4xf32>
    %90 = vector.broadcast %88 : vector<4x1xf32> to vector<4x4xf32>
    %91 = vector.broadcast %89 : vector<1x4xf32> to vector<4x4xf32>
    %92 = arith.mulf %90, %91 : vector<4x4xf32>
    %93 = vector.extract_strided_slice %87 {offsets = [0, 1], sizes = [4, 1], strides = [1, 1]} : vector<4x4xf32> to vector<4x1xf32>
    %94 = vector.extract_strided_slice %87 {offsets = [1, 0], sizes = [1, 4], strides = [1, 1]} : vector<4x4xf32> to vector<1x4xf32>
    %95 = vector.broadcast %93 : vector<4x1xf32> to vector<4x4xf32>
    %96 = vector.broadcast %94 : vector<1x4xf32> to vector<4x4xf32>
    %97 = arith.mulf %95, %96 : vector<4x4xf32>
    %98 = arith.addf %92, %97 : vector<4x4xf32>
    %99 = vector.extract_strided_slice %87 {offsets = [0, 2], sizes = [4, 1], strides = [1, 1]} : vector<4x4xf32> to vector<4x1xf32>
    %100 = vector.extract_strided_slice %87 {offsets = [2, 0], sizes = [1, 4], strides = [1, 1]} : vector<4x4xf32> to vector<1x4xf32>
    %101 = vector.broadcast %99 : vector<4x1xf32> to vector<4x4xf32>
    %102 = vector.broadcast %100 : vector<1x4xf32> to vector<4x4xf32>
    %103 = arith.mulf %101, %102 : vector<4x4xf32>
    %104 = arith.addf %98, %103 : vector<4x4xf32>
    %105 = vector.extract_strided_slice %87 {offsets = [0, 3], sizes = [4, 1], strides = [1, 1]} : vector<4x4xf32> to vector<4x1xf32>
    %106 = vector.extract_strided_slice %87 {offsets = [3, 0], sizes = [1, 4], strides = [1, 1]} : vector<4x4xf32> to vector<1x4xf32>
    %107 = vector.broadcast %105 : vector<4x1xf32> to vector<4x4xf32>
    %108 = vector.broadcast %106 : vector<1x4xf32> to vector<4x4xf32>
    %109 = arith.mulf %107, %108 : vector<4x4xf32>
    %110 = arith.addf %104, %109 : vector<4x4xf32>
    %111 = arith.mulf %20, %20 : vector<1x1xf32>
    %112 = arith.mulf %21, %21 : vector<1x1xf32>
    %113 = arith.addf %111, %112 : vector<1x1xf32>
    %114 = arith.mulf %22, %22 : vector<1x1xf32>
    %115 = arith.addf %113, %114 : vector<1x1xf32>
    %cst_18 = arith.constant 0.000000e+00 : f32
    %116 = vector.broadcast %cst_18 : f32 to vector<1x1xf32>
    %cst_19 = arith.constant 0.000000e+00 : f32
    %117 = vector.broadcast %cst_19 : f32 to vector<1x1xf32>
    %cst_20 = arith.constant 0.000000e+00 : f32
    %118 = vector.broadcast %cst_20 : f32 to vector<1x1xf32>
    %cst_21 = arith.constant 1.000000e+00 : f32
    %119 = vector.broadcast %cst_21 : f32 to vector<1x1xf32>
    %cst_22 = arith.constant 1.000000e+00 : f32
    %120 = vector.broadcast %cst_22 : f32 to vector<1x1xf32>
    %121 = arith.mulf %120, %119 : vector<1x1xf32>
    %122 = arith.addf %116, %121 : vector<1x1xf32>
    %cst_23 = arith.constant 5.000000e-01 : f32
    %123 = vector.broadcast %cst_23 : f32 to vector<1x1xf32>
    %124 = arith.mulf %123, %119 : vector<1x1xf32>
    %125 = arith.addf %117, %124 : vector<1x1xf32>
    %cst_24 = arith.constant 0.166666672 : f32
    %126 = vector.broadcast %cst_24 : f32 to vector<1x1xf32>
    %127 = arith.mulf %126, %119 : vector<1x1xf32>
    %128 = arith.addf %118, %127 : vector<1x1xf32>
    %129 = arith.mulf %119, %115 : vector<1x1xf32>
    %cst_25 = arith.constant -0.166666672 : f32
    %130 = vector.broadcast %cst_25 : f32 to vector<1x1xf32>
    %131 = arith.mulf %130, %129 : vector<1x1xf32>
    %132 = arith.addf %122, %131 : vector<1x1xf32>
    %cst_26 = arith.constant -0.0416666679 : f32
    %133 = vector.broadcast %cst_26 : f32 to vector<1x1xf32>
    %134 = arith.mulf %133, %129 : vector<1x1xf32>
    %135 = arith.addf %125, %134 : vector<1x1xf32>
    %cst_27 = arith.constant -0.00833333377 : f32
    %136 = vector.broadcast %cst_27 : f32 to vector<1x1xf32>
    %137 = arith.mulf %136, %129 : vector<1x1xf32>
    %138 = arith.addf %128, %137 : vector<1x1xf32>
    %139 = arith.mulf %129, %115 : vector<1x1xf32>
    %cst_28 = arith.constant 0.00833333377 : f32
    %140 = vector.broadcast %cst_28 : f32 to vector<1x1xf32>
    %141 = arith.mulf %140, %139 : vector<1x1xf32>
    %142 = arith.addf %132, %141 : vector<1x1xf32>
    %cst_29 = arith.constant 0.00138888892 : f32
    %143 = vector.broadcast %cst_29 : f32 to vector<1x1xf32>
    %144 = arith.mulf %143, %139 : vector<1x1xf32>
    %145 = arith.addf %135, %144 : vector<1x1xf32>
    %cst_30 = arith.constant 1.98412701E-4 : f32
    %146 = vector.broadcast %cst_30 : f32 to vector<1x1xf32>
    %147 = arith.mulf %146, %139 : vector<1x1xf32>
    %148 = arith.addf %138, %147 : vector<1x1xf32>
    %149 = arith.mulf %139, %115 : vector<1x1xf32>
    %cst_31 = arith.constant -1.98412701E-4 : f32
    %150 = vector.broadcast %cst_31 : f32 to vector<1x1xf32>
    %151 = arith.mulf %150, %149 : vector<1x1xf32>
    %152 = arith.addf %142, %151 : vector<1x1xf32>
    %cst_32 = arith.constant -2.48015876E-5 : f32
    %153 = vector.broadcast %cst_32 : f32 to vector<1x1xf32>
    %154 = arith.mulf %153, %149 : vector<1x1xf32>
    %155 = arith.addf %145, %154 : vector<1x1xf32>
    %cst_33 = arith.constant -2.75573188E-6 : f32
    %156 = vector.broadcast %cst_33 : f32 to vector<1x1xf32>
    %157 = arith.mulf %156, %149 : vector<1x1xf32>
    %158 = arith.addf %148, %157 : vector<1x1xf32>
    %159 = arith.mulf %149, %115 : vector<1x1xf32>
    %cst_34 = arith.constant 2.75573188E-6 : f32
    %160 = vector.broadcast %cst_34 : f32 to vector<1x1xf32>
    %161 = arith.mulf %160, %159 : vector<1x1xf32>
    %162 = arith.addf %152, %161 : vector<1x1xf32>
    %cst_35 = arith.constant 2.755732E-7 : f32
    %163 = vector.broadcast %cst_35 : f32 to vector<1x1xf32>
    %164 = arith.mulf %163, %159 : vector<1x1xf32>
    %165 = arith.addf %155, %164 : vector<1x1xf32>
    %cst_36 = arith.constant 2.50521079E-8 : f32
    %166 = vector.broadcast %cst_36 : f32 to vector<1x1xf32>
    %167 = arith.mulf %166, %159 : vector<1x1xf32>
    %168 = arith.addf %158, %167 : vector<1x1xf32>
    %169 = arith.mulf %159, %115 : vector<1x1xf32>
    %cst_37 = arith.constant -2.50521079E-8 : f32
    %170 = vector.broadcast %cst_37 : f32 to vector<1x1xf32>
    %171 = arith.mulf %170, %169 : vector<1x1xf32>
    %172 = arith.addf %162, %171 : vector<1x1xf32>
    %cst_38 = arith.constant -2.08767559E-9 : f32
    %173 = vector.broadcast %cst_38 : f32 to vector<1x1xf32>
    %174 = arith.mulf %173, %169 : vector<1x1xf32>
    %175 = arith.addf %165, %174 : vector<1x1xf32>
    %cst_39 = arith.constant -1.60590444E-10 : f32
    %176 = vector.broadcast %cst_39 : f32 to vector<1x1xf32>
    %177 = arith.mulf %176, %169 : vector<1x1xf32>
    %178 = arith.addf %168, %177 : vector<1x1xf32>
    %179 = arith.mulf %169, %115 : vector<1x1xf32>
    %cst_40 = arith.constant 1.60590444E-10 : f32
    %180 = vector.broadcast %cst_40 : f32 to vector<1x1xf32>
    %181 = arith.mulf %180, %179 : vector<1x1xf32>
    %182 = arith.addf %172, %181 : vector<1x1xf32>
    %cst_41 = arith.constant 1.14707454E-11 : f32
    %183 = vector.broadcast %cst_41 : f32 to vector<1x1xf32>
    %184 = arith.mulf %183, %179 : vector<1x1xf32>
    %185 = arith.addf %175, %184 : vector<1x1xf32>
    %cst_42 = arith.constant 7.6471636E-13 : f32
    %186 = vector.broadcast %cst_42 : f32 to vector<1x1xf32>
    %187 = arith.mulf %186, %179 : vector<1x1xf32>
    %188 = arith.addf %178, %187 : vector<1x1xf32>
    %189 = arith.mulf %179, %115 : vector<1x1xf32>
    %cst_43 = arith.constant -7.6471636E-13 : f32
    %190 = vector.broadcast %cst_43 : f32 to vector<1x1xf32>
    %191 = arith.mulf %190, %189 : vector<1x1xf32>
    %192 = arith.addf %182, %191 : vector<1x1xf32>
    %cst_44 = arith.constant -4.77947726E-14 : f32
    %193 = vector.broadcast %cst_44 : f32 to vector<1x1xf32>
    %194 = arith.mulf %193, %189 : vector<1x1xf32>
    %195 = arith.addf %185, %194 : vector<1x1xf32>
    %cst_45 = arith.constant -2.81145736E-15 : f32
    %196 = vector.broadcast %cst_45 : f32 to vector<1x1xf32>
    %197 = arith.mulf %196, %189 : vector<1x1xf32>
    %198 = arith.addf %188, %197 : vector<1x1xf32>
    %199 = arith.mulf %189, %115 : vector<1x1xf32>
    %cst_46 = arith.constant 2.81145736E-15 : f32
    %200 = vector.broadcast %cst_46 : f32 to vector<1x1xf32>
    %201 = arith.mulf %200, %199 : vector<1x1xf32>
    %202 = arith.addf %192, %201 : vector<1x1xf32>
    %cst_47 = arith.constant 1.56192068E-16 : f32
    %203 = vector.broadcast %cst_47 : f32 to vector<1x1xf32>
    %204 = arith.mulf %203, %199 : vector<1x1xf32>
    %205 = arith.addf %195, %204 : vector<1x1xf32>
    %cst_48 = arith.constant 8.22063508E-18 : f32
    %206 = vector.broadcast %cst_48 : f32 to vector<1x1xf32>
    %207 = arith.mulf %206, %199 : vector<1x1xf32>
    %208 = arith.addf %198, %207 : vector<1x1xf32>
    %209 = arith.mulf %199, %115 : vector<1x1xf32>
    %cst_49 = arith.constant -8.22063508E-18 : f32
    %210 = vector.broadcast %cst_49 : f32 to vector<1x1xf32>
    %211 = arith.mulf %210, %209 : vector<1x1xf32>
    %212 = arith.addf %202, %211 : vector<1x1xf32>
    %cst_50 = arith.constant -4.11031759E-19 : f32
    %213 = vector.broadcast %cst_50 : f32 to vector<1x1xf32>
    %214 = arith.mulf %213, %209 : vector<1x1xf32>
    %215 = arith.addf %205, %214 : vector<1x1xf32>
    %cst_51 = arith.constant -1.95729415E-20 : f32
    %216 = vector.broadcast %cst_51 : f32 to vector<1x1xf32>
    %217 = arith.mulf %216, %209 : vector<1x1xf32>
    %218 = arith.addf %208, %217 : vector<1x1xf32>
    %219 = arith.mulf %209, %115 : vector<1x1xf32>
    %cst_52 = arith.constant 1.95729415E-20 : f32
    %220 = vector.broadcast %cst_52 : f32 to vector<1x1xf32>
    %221 = arith.mulf %220, %219 : vector<1x1xf32>
    %222 = arith.addf %212, %221 : vector<1x1xf32>
    %cst_53 = arith.constant 8.89679095E-22 : f32
    %223 = vector.broadcast %cst_53 : f32 to vector<1x1xf32>
    %224 = arith.mulf %223, %219 : vector<1x1xf32>
    %225 = arith.addf %215, %224 : vector<1x1xf32>
    %cst_54 = arith.constant 3.8681703E-23 : f32
    %226 = vector.broadcast %cst_54 : f32 to vector<1x1xf32>
    %227 = arith.mulf %226, %219 : vector<1x1xf32>
    %228 = arith.addf %218, %227 : vector<1x1xf32>
    %229 = vector.broadcast %222 : vector<1x1xf32> to vector<4x4xf32>
    %230 = arith.mulf %229, %87 : vector<4x4xf32>
    %231 = arith.addf %12, %230 : vector<4x4xf32>
    %232 = vector.broadcast %225 : vector<1x1xf32> to vector<4x4xf32>
    %233 = arith.mulf %232, %110 : vector<4x4xf32>
    %234 = arith.addf %231, %233 : vector<4x4xf32>
    %235 = vector.broadcast %222 : vector<1x1xf32> to vector<4x4xf32>
    %236 = arith.mulf %235, %87 : vector<4x4xf32>
    %237 = arith.subf %12, %236 : vector<4x4xf32>
    %238 = vector.broadcast %225 : vector<1x1xf32> to vector<4x4xf32>
    %239 = arith.mulf %238, %110 : vector<4x4xf32>
    %240 = arith.addf %237, %239 : vector<4x4xf32>
    %241 = vector.broadcast %225 : vector<1x1xf32> to vector<4x4xf32>
    %242 = arith.mulf %241, %87 : vector<4x4xf32>
    %243 = arith.addf %12, %242 : vector<4x4xf32>
    %244 = vector.broadcast %228 : vector<1x1xf32> to vector<4x4xf32>
    %245 = arith.mulf %244, %110 : vector<4x4xf32>
    %246 = arith.addf %243, %245 : vector<4x4xf32>
    %247 = vector.broadcast %225 : vector<1x1xf32> to vector<4x4xf32>
    %248 = arith.mulf %247, %87 : vector<4x4xf32>
    %249 = arith.subf %12, %248 : vector<4x4xf32>
    %250 = vector.broadcast %228 : vector<1x1xf32> to vector<4x4xf32>
    %251 = arith.mulf %250, %110 : vector<4x4xf32>
    %252 = arith.addf %249, %251 : vector<4x4xf32>
    %253 = vector.extract_strided_slice %4 {offsets = [0, 0], sizes = [1, 1], strides = [1, 1]} : vector<1x4xf32> to vector<1x1xf32>
    %254 = vector.extract_strided_slice %4 {offsets = [0, 1], sizes = [1, 1], strides = [1, 1]} : vector<1x4xf32> to vector<1x1xf32>
    %255 = vector.extract_strided_slice %4 {offsets = [0, 2], sizes = [1, 1], strides = [1, 1]} : vector<1x4xf32> to vector<1x1xf32>
    %c0_i32_55 = arith.constant 0 : i32
    %256 = vector.broadcast %c0_i32_55 : i32 to vector<4x4xi32>
    %257 = arith.cmpi eq, %5, %256 : vector<4x4xi32>
    %c3_i32_56 = arith.constant 3 : i32
    %258 = vector.broadcast %c3_i32_56 : i32 to vector<4x4xi32>
    %259 = arith.cmpi eq, %6, %258 : vector<4x4xi32>
    %260 = arith.andi %257, %259 : vector<4x4xi1>
    %261 = arith.extui %260 : vector<4x4xi1> to vector<4x4xi32>
    %262 = arith.sitofp %261 : vector<4x4xi32> to vector<4x4xf32>
    %263 = vector.broadcast %253 : vector<1x1xf32> to vector<4x4xf32>
    %264 = arith.mulf %263, %262 : vector<4x4xf32>
    %c1_i32_57 = arith.constant 1 : i32
    %265 = vector.broadcast %c1_i32_57 : i32 to vector<4x4xi32>
    %266 = arith.cmpi eq, %5, %265 : vector<4x4xi32>
    %c3_i32_58 = arith.constant 3 : i32
    %267 = vector.broadcast %c3_i32_58 : i32 to vector<4x4xi32>
    %268 = arith.cmpi eq, %6, %267 : vector<4x4xi32>
    %269 = arith.andi %266, %268 : vector<4x4xi1>
    %270 = arith.extui %269 : vector<4x4xi1> to vector<4x4xi32>
    %271 = arith.sitofp %270 : vector<4x4xi32> to vector<4x4xf32>
    %272 = vector.broadcast %254 : vector<1x1xf32> to vector<4x4xf32>
    %273 = arith.mulf %272, %271 : vector<4x4xf32>
    %274 = arith.addf %264, %273 : vector<4x4xf32>
    %c2_i32_59 = arith.constant 2 : i32
    %275 = vector.broadcast %c2_i32_59 : i32 to vector<4x4xi32>
    %276 = arith.cmpi eq, %5, %275 : vector<4x4xi32>
    %c3_i32_60 = arith.constant 3 : i32
    %277 = vector.broadcast %c3_i32_60 : i32 to vector<4x4xi32>
    %278 = arith.cmpi eq, %6, %277 : vector<4x4xi32>
    %279 = arith.andi %276, %278 : vector<4x4xi1>
    %280 = arith.extui %279 : vector<4x4xi1> to vector<4x4xi32>
    %281 = arith.sitofp %280 : vector<4x4xi32> to vector<4x4xf32>
    %282 = vector.broadcast %255 : vector<1x1xf32> to vector<4x4xf32>
    %283 = arith.mulf %282, %281 : vector<4x4xf32>
    %284 = arith.addf %274, %283 : vector<4x4xf32>
    %c3_i32_61 = arith.constant 3 : i32
    %285 = vector.broadcast %c3_i32_61 : i32 to vector<4x4xi32>
    %286 = arith.cmpi eq, %5, %285 : vector<4x4xi32>
    %c0_i32_62 = arith.constant 0 : i32
    %287 = vector.broadcast %c0_i32_62 : i32 to vector<4x4xi32>
    %288 = arith.cmpi eq, %6, %287 : vector<4x4xi32>
    %289 = arith.andi %286, %288 : vector<4x4xi1>
    %290 = arith.extui %289 : vector<4x4xi1> to vector<4x4xi32>
    %291 = arith.sitofp %290 : vector<4x4xi32> to vector<4x4xf32>
    %292 = vector.broadcast %253 : vector<1x1xf32> to vector<4x4xf32>
    %293 = arith.mulf %292, %291 : vector<4x4xf32>
    %c3_i32_63 = arith.constant 3 : i32
    %294 = vector.broadcast %c3_i32_63 : i32 to vector<4x4xi32>
    %295 = arith.cmpi eq, %5, %294 : vector<4x4xi32>
    %c1_i32_64 = arith.constant 1 : i32
    %296 = vector.broadcast %c1_i32_64 : i32 to vector<4x4xi32>
    %297 = arith.cmpi eq, %6, %296 : vector<4x4xi32>
    %298 = arith.andi %295, %297 : vector<4x4xi1>
    %299 = arith.extui %298 : vector<4x4xi1> to vector<4x4xi32>
    %300 = arith.sitofp %299 : vector<4x4xi32> to vector<4x4xf32>
    %301 = vector.broadcast %254 : vector<1x1xf32> to vector<4x4xf32>
    %302 = arith.mulf %301, %300 : vector<4x4xf32>
    %303 = arith.addf %293, %302 : vector<4x4xf32>
    %c3_i32_65 = arith.constant 3 : i32
    %304 = vector.broadcast %c3_i32_65 : i32 to vector<4x4xi32>
    %305 = arith.cmpi eq, %5, %304 : vector<4x4xi32>
    %c2_i32_66 = arith.constant 2 : i32
    %306 = vector.broadcast %c2_i32_66 : i32 to vector<4x4xi32>
    %307 = arith.cmpi eq, %6, %306 : vector<4x4xi32>
    %308 = arith.andi %305, %307 : vector<4x4xi1>
    %309 = arith.extui %308 : vector<4x4xi1> to vector<4x4xi32>
    %310 = arith.sitofp %309 : vector<4x4xi32> to vector<4x4xf32>
    %311 = vector.broadcast %255 : vector<1x1xf32> to vector<4x4xf32>
    %312 = arith.mulf %311, %310 : vector<4x4xf32>
    %313 = arith.addf %303, %312 : vector<4x4xf32>
    %314 = vector.extract_strided_slice %246 {offsets = [0, 0], sizes = [4, 1], strides = [1, 1]} : vector<4x4xf32> to vector<4x1xf32>
    %315 = vector.extract_strided_slice %284 {offsets = [0, 0], sizes = [1, 4], strides = [1, 1]} : vector<4x4xf32> to vector<1x4xf32>
    %316 = vector.broadcast %314 : vector<4x1xf32> to vector<4x4xf32>
    %317 = vector.broadcast %315 : vector<1x4xf32> to vector<4x4xf32>
    %318 = arith.mulf %316, %317 : vector<4x4xf32>
    %319 = vector.extract_strided_slice %246 {offsets = [0, 1], sizes = [4, 1], strides = [1, 1]} : vector<4x4xf32> to vector<4x1xf32>
    %320 = vector.extract_strided_slice %284 {offsets = [1, 0], sizes = [1, 4], strides = [1, 1]} : vector<4x4xf32> to vector<1x4xf32>
    %321 = vector.broadcast %319 : vector<4x1xf32> to vector<4x4xf32>
    %322 = vector.broadcast %320 : vector<1x4xf32> to vector<4x4xf32>
    %323 = arith.mulf %321, %322 : vector<4x4xf32>
    %324 = arith.addf %318, %323 : vector<4x4xf32>
    %325 = vector.extract_strided_slice %246 {offsets = [0, 2], sizes = [4, 1], strides = [1, 1]} : vector<4x4xf32> to vector<4x1xf32>
    %326 = vector.extract_strided_slice %284 {offsets = [2, 0], sizes = [1, 4], strides = [1, 1]} : vector<4x4xf32> to vector<1x4xf32>
    %327 = vector.broadcast %325 : vector<4x1xf32> to vector<4x4xf32>
    %328 = vector.broadcast %326 : vector<1x4xf32> to vector<4x4xf32>
    %329 = arith.mulf %327, %328 : vector<4x4xf32>
    %330 = arith.addf %324, %329 : vector<4x4xf32>
    %331 = vector.extract_strided_slice %246 {offsets = [0, 3], sizes = [4, 1], strides = [1, 1]} : vector<4x4xf32> to vector<4x1xf32>
    %332 = vector.extract_strided_slice %284 {offsets = [3, 0], sizes = [1, 4], strides = [1, 1]} : vector<4x4xf32> to vector<1x4xf32>
    %333 = vector.broadcast %331 : vector<4x1xf32> to vector<4x4xf32>
    %334 = vector.broadcast %332 : vector<1x4xf32> to vector<4x4xf32>
    %335 = arith.mulf %333, %334 : vector<4x4xf32>
    %336 = arith.addf %330, %335 : vector<4x4xf32>
    %337 = vector.extract_strided_slice %240 {offsets = [0, 0], sizes = [4, 1], strides = [1, 1]} : vector<4x4xf32> to vector<4x1xf32>
    %338 = vector.extract_strided_slice %336 {offsets = [0, 0], sizes = [1, 4], strides = [1, 1]} : vector<4x4xf32> to vector<1x4xf32>
    %339 = vector.broadcast %337 : vector<4x1xf32> to vector<4x4xf32>
    %340 = vector.broadcast %338 : vector<1x4xf32> to vector<4x4xf32>
    %341 = arith.mulf %339, %340 : vector<4x4xf32>
    %342 = vector.extract_strided_slice %240 {offsets = [0, 1], sizes = [4, 1], strides = [1, 1]} : vector<4x4xf32> to vector<4x1xf32>
    %343 = vector.extract_strided_slice %336 {offsets = [1, 0], sizes = [1, 4], strides = [1, 1]} : vector<4x4xf32> to vector<1x4xf32>
    %344 = vector.broadcast %342 : vector<4x1xf32> to vector<4x4xf32>
    %345 = vector.broadcast %343 : vector<1x4xf32> to vector<4x4xf32>
    %346 = arith.mulf %344, %345 : vector<4x4xf32>
    %347 = arith.addf %341, %346 : vector<4x4xf32>
    %348 = vector.extract_strided_slice %240 {offsets = [0, 2], sizes = [4, 1], strides = [1, 1]} : vector<4x4xf32> to vector<4x1xf32>
    %349 = vector.extract_strided_slice %336 {offsets = [2, 0], sizes = [1, 4], strides = [1, 1]} : vector<4x4xf32> to vector<1x4xf32>
    %350 = vector.broadcast %348 : vector<4x1xf32> to vector<4x4xf32>
    %351 = vector.broadcast %349 : vector<1x4xf32> to vector<4x4xf32>
    %352 = arith.mulf %350, %351 : vector<4x4xf32>
    %353 = arith.addf %347, %352 : vector<4x4xf32>
    %354 = vector.extract_strided_slice %240 {offsets = [0, 3], sizes = [4, 1], strides = [1, 1]} : vector<4x4xf32> to vector<4x1xf32>
    %355 = vector.extract_strided_slice %336 {offsets = [3, 0], sizes = [1, 4], strides = [1, 1]} : vector<4x4xf32> to vector<1x4xf32>
    %356 = vector.broadcast %354 : vector<4x1xf32> to vector<4x4xf32>
    %357 = vector.broadcast %355 : vector<1x4xf32> to vector<4x4xf32>
    %358 = arith.mulf %356, %357 : vector<4x4xf32>
    %359 = arith.addf %353, %358 : vector<4x4xf32>
    %360 = arith.subf %240, %359 : vector<4x4xf32>
    %c3_i32_67 = arith.constant 3 : i32
    %361 = vector.broadcast %c3_i32_67 : i32 to vector<4x4xi32>
    %362 = arith.cmpi eq, %5, %361 : vector<4x4xi32>
    %c3_i32_68 = arith.constant 3 : i32
    %363 = vector.broadcast %c3_i32_68 : i32 to vector<4x4xi32>
    %364 = arith.cmpi eq, %6, %363 : vector<4x4xi32>
    %365 = arith.andi %362, %364 : vector<4x4xi1>
    %366 = arith.extui %365 : vector<4x4xi1> to vector<4x4xi32>
    %367 = arith.sitofp %366 : vector<4x4xi32> to vector<4x4xf32>
    %368 = arith.addf %360, %367 : vector<4x4xf32>
    %369 = vector.extract_strided_slice %0 {offsets = [0, 0], sizes = [4, 1], strides = [1, 1]} : vector<4x4xf32> to vector<4x1xf32>
    %370 = vector.extract_strided_slice %368 {offsets = [0, 0], sizes = [1, 4], strides = [1, 1]} : vector<4x4xf32> to vector<1x4xf32>
    %371 = vector.broadcast %369 : vector<4x1xf32> to vector<4x4xf32>
    %372 = vector.broadcast %370 : vector<1x4xf32> to vector<4x4xf32>
    %373 = arith.mulf %371, %372 : vector<4x4xf32>
    %374 = vector.extract_strided_slice %0 {offsets = [0, 1], sizes = [4, 1], strides = [1, 1]} : vector<4x4xf32> to vector<4x1xf32>
    %375 = vector.extract_strided_slice %368 {offsets = [1, 0], sizes = [1, 4], strides = [1, 1]} : vector<4x4xf32> to vector<1x4xf32>
    %376 = vector.broadcast %374 : vector<4x1xf32> to vector<4x4xf32>
    %377 = vector.broadcast %375 : vector<1x4xf32> to vector<4x4xf32>
    %378 = arith.mulf %376, %377 : vector<4x4xf32>
    %379 = arith.addf %373, %378 : vector<4x4xf32>
    %380 = vector.extract_strided_slice %0 {offsets = [0, 2], sizes = [4, 1], strides = [1, 1]} : vector<4x4xf32> to vector<4x1xf32>
    %381 = vector.extract_strided_slice %368 {offsets = [2, 0], sizes = [1, 4], strides = [1, 1]} : vector<4x4xf32> to vector<1x4xf32>
    %382 = vector.broadcast %380 : vector<4x1xf32> to vector<4x4xf32>
    %383 = vector.broadcast %381 : vector<1x4xf32> to vector<4x4xf32>
    %384 = arith.mulf %382, %383 : vector<4x4xf32>
    %385 = arith.addf %379, %384 : vector<4x4xf32>
    %386 = vector.extract_strided_slice %0 {offsets = [0, 3], sizes = [4, 1], strides = [1, 1]} : vector<4x4xf32> to vector<4x1xf32>
    %387 = vector.extract_strided_slice %368 {offsets = [3, 0], sizes = [1, 4], strides = [1, 1]} : vector<4x4xf32> to vector<1x4xf32>
    %388 = vector.broadcast %386 : vector<4x1xf32> to vector<4x4xf32>
    %389 = vector.broadcast %387 : vector<1x4xf32> to vector<4x4xf32>
    %390 = arith.mulf %388, %389 : vector<4x4xf32>
    %391 = arith.addf %385, %390 : vector<4x4xf32>
    %392 = vector.extract_strided_slice %313 {offsets = [0, 0], sizes = [4, 1], strides = [1, 1]} : vector<4x4xf32> to vector<4x1xf32>
    %393 = vector.extract_strided_slice %252 {offsets = [0, 0], sizes = [1, 4], strides = [1, 1]} : vector<4x4xf32> to vector<1x4xf32>
    %394 = vector.broadcast %392 : vector<4x1xf32> to vector<4x4xf32>
    %395 = vector.broadcast %393 : vector<1x4xf32> to vector<4x4xf32>
    %396 = arith.mulf %394, %395 : vector<4x4xf32>
    %397 = vector.extract_strided_slice %313 {offsets = [0, 1], sizes = [4, 1], strides = [1, 1]} : vector<4x4xf32> to vector<4x1xf32>
    %398 = vector.extract_strided_slice %252 {offsets = [1, 0], sizes = [1, 4], strides = [1, 1]} : vector<4x4xf32> to vector<1x4xf32>
    %399 = vector.broadcast %397 : vector<4x1xf32> to vector<4x4xf32>
    %400 = vector.broadcast %398 : vector<1x4xf32> to vector<4x4xf32>
    %401 = arith.mulf %399, %400 : vector<4x4xf32>
    %402 = arith.addf %396, %401 : vector<4x4xf32>
    %403 = vector.extract_strided_slice %313 {offsets = [0, 2], sizes = [4, 1], strides = [1, 1]} : vector<4x4xf32> to vector<4x1xf32>
    %404 = vector.extract_strided_slice %252 {offsets = [2, 0], sizes = [1, 4], strides = [1, 1]} : vector<4x4xf32> to vector<1x4xf32>
    %405 = vector.broadcast %403 : vector<4x1xf32> to vector<4x4xf32>
    %406 = vector.broadcast %404 : vector<1x4xf32> to vector<4x4xf32>
    %407 = arith.mulf %405, %406 : vector<4x4xf32>
    %408 = arith.addf %402, %407 : vector<4x4xf32>
    %409 = vector.extract_strided_slice %313 {offsets = [0, 3], sizes = [4, 1], strides = [1, 1]} : vector<4x4xf32> to vector<4x1xf32>
    %410 = vector.extract_strided_slice %252 {offsets = [3, 0], sizes = [1, 4], strides = [1, 1]} : vector<4x4xf32> to vector<1x4xf32>
    %411 = vector.broadcast %409 : vector<4x1xf32> to vector<4x4xf32>
    %412 = vector.broadcast %410 : vector<1x4xf32> to vector<4x4xf32>
    %413 = arith.mulf %411, %412 : vector<4x4xf32>
    %414 = arith.addf %408, %413 : vector<4x4xf32>
    %415 = vector.extract_strided_slice %414 {offsets = [0, 0], sizes = [4, 1], strides = [1, 1]} : vector<4x4xf32> to vector<4x1xf32>
    %416 = vector.extract_strided_slice %234 {offsets = [0, 0], sizes = [1, 4], strides = [1, 1]} : vector<4x4xf32> to vector<1x4xf32>
    %417 = vector.broadcast %415 : vector<4x1xf32> to vector<4x4xf32>
    %418 = vector.broadcast %416 : vector<1x4xf32> to vector<4x4xf32>
    %419 = arith.mulf %417, %418 : vector<4x4xf32>
    %420 = vector.extract_strided_slice %414 {offsets = [0, 1], sizes = [4, 1], strides = [1, 1]} : vector<4x4xf32> to vector<4x1xf32>
    %421 = vector.extract_strided_slice %234 {offsets = [1, 0], sizes = [1, 4], strides = [1, 1]} : vector<4x4xf32> to vector<1x4xf32>
    %422 = vector.broadcast %420 : vector<4x1xf32> to vector<4x4xf32>
    %423 = vector.broadcast %421 : vector<1x4xf32> to vector<4x4xf32>
    %424 = arith.mulf %422, %423 : vector<4x4xf32>
    %425 = arith.addf %419, %424 : vector<4x4xf32>
    %426 = vector.extract_strided_slice %414 {offsets = [0, 2], sizes = [4, 1], strides = [1, 1]} : vector<4x4xf32> to vector<4x1xf32>
    %427 = vector.extract_strided_slice %234 {offsets = [2, 0], sizes = [1, 4], strides = [1, 1]} : vector<4x4xf32> to vector<1x4xf32>
    %428 = vector.broadcast %426 : vector<4x1xf32> to vector<4x4xf32>
    %429 = vector.broadcast %427 : vector<1x4xf32> to vector<4x4xf32>
    %430 = arith.mulf %428, %429 : vector<4x4xf32>
    %431 = arith.addf %425, %430 : vector<4x4xf32>
    %432 = vector.extract_strided_slice %414 {offsets = [0, 3], sizes = [4, 1], strides = [1, 1]} : vector<4x4xf32> to vector<4x1xf32>
    %433 = vector.extract_strided_slice %234 {offsets = [3, 0], sizes = [1, 4], strides = [1, 1]} : vector<4x4xf32> to vector<1x4xf32>
    %434 = vector.broadcast %432 : vector<4x1xf32> to vector<4x4xf32>
    %435 = vector.broadcast %433 : vector<1x4xf32> to vector<4x4xf32>
    %436 = arith.mulf %434, %435 : vector<4x4xf32>
    %437 = arith.addf %431, %436 : vector<4x4xf32>
    %438 = arith.subf %234, %437 : vector<4x4xf32>
    %c3_i32_69 = arith.constant 3 : i32
    %439 = vector.broadcast %c3_i32_69 : i32 to vector<4x4xi32>
    %440 = arith.cmpi eq, %5, %439 : vector<4x4xi32>
    %c3_i32_70 = arith.constant 3 : i32
    %441 = vector.broadcast %c3_i32_70 : i32 to vector<4x4xi32>
    %442 = arith.cmpi eq, %6, %441 : vector<4x4xi32>
    %443 = arith.andi %440, %442 : vector<4x4xi1>
    %444 = arith.extui %443 : vector<4x4xi1> to vector<4x4xi32>
    %445 = arith.sitofp %444 : vector<4x4xi32> to vector<4x4xf32>
    %446 = arith.addf %438, %445 : vector<4x4xf32>
    %447 = vector.extract_strided_slice %446 {offsets = [0, 0], sizes = [4, 1], strides = [1, 1]} : vector<4x4xf32> to vector<4x1xf32>
    %448 = vector.extract_strided_slice %1 {offsets = [0, 0], sizes = [1, 4], strides = [1, 1]} : vector<4x4xf32> to vector<1x4xf32>
    %449 = vector.broadcast %447 : vector<4x1xf32> to vector<4x4xf32>
    %450 = vector.broadcast %448 : vector<1x4xf32> to vector<4x4xf32>
    %451 = arith.mulf %449, %450 : vector<4x4xf32>
    %452 = vector.extract_strided_slice %446 {offsets = [0, 1], sizes = [4, 1], strides = [1, 1]} : vector<4x4xf32> to vector<4x1xf32>
    %453 = vector.extract_strided_slice %1 {offsets = [1, 0], sizes = [1, 4], strides = [1, 1]} : vector<4x4xf32> to vector<1x4xf32>
    %454 = vector.broadcast %452 : vector<4x1xf32> to vector<4x4xf32>
    %455 = vector.broadcast %453 : vector<1x4xf32> to vector<4x4xf32>
    %456 = arith.mulf %454, %455 : vector<4x4xf32>
    %457 = arith.addf %451, %456 : vector<4x4xf32>
    %458 = vector.extract_strided_slice %446 {offsets = [0, 2], sizes = [4, 1], strides = [1, 1]} : vector<4x4xf32> to vector<4x1xf32>
    %459 = vector.extract_strided_slice %1 {offsets = [2, 0], sizes = [1, 4], strides = [1, 1]} : vector<4x4xf32> to vector<1x4xf32>
    %460 = vector.broadcast %458 : vector<4x1xf32> to vector<4x4xf32>
    %461 = vector.broadcast %459 : vector<1x4xf32> to vector<4x4xf32>
    %462 = arith.mulf %460, %461 : vector<4x4xf32>
    %463 = arith.addf %457, %462 : vector<4x4xf32>
    %464 = vector.extract_strided_slice %446 {offsets = [0, 3], sizes = [4, 1], strides = [1, 1]} : vector<4x4xf32> to vector<4x1xf32>
    %465 = vector.extract_strided_slice %1 {offsets = [3, 0], sizes = [1, 4], strides = [1, 1]} : vector<4x4xf32> to vector<1x4xf32>
    %466 = vector.broadcast %464 : vector<4x1xf32> to vector<4x4xf32>
    %467 = vector.broadcast %465 : vector<1x4xf32> to vector<4x4xf32>
    %468 = arith.mulf %466, %467 : vector<4x4xf32>
    %469 = arith.addf %463, %468 : vector<4x4xf32>
    %470 = vector.extract_strided_slice %469 {offsets = [0, 0], sizes = [4, 1], strides = [1, 1]} : vector<4x4xf32> to vector<4x1xf32>
    %471 = vector.extract_strided_slice %2 {offsets = [0, 0], sizes = [1, 4], strides = [1, 1]} : vector<4x4xf32> to vector<1x4xf32>
    %472 = vector.broadcast %470 : vector<4x1xf32> to vector<4x4xf32>
    %473 = vector.broadcast %471 : vector<1x4xf32> to vector<4x4xf32>
    %474 = arith.mulf %472, %473 : vector<4x4xf32>
    %475 = vector.extract_strided_slice %469 {offsets = [0, 1], sizes = [4, 1], strides = [1, 1]} : vector<4x4xf32> to vector<4x1xf32>
    %476 = vector.extract_strided_slice %2 {offsets = [1, 0], sizes = [1, 4], strides = [1, 1]} : vector<4x4xf32> to vector<1x4xf32>
    %477 = vector.broadcast %475 : vector<4x1xf32> to vector<4x4xf32>
    %478 = vector.broadcast %476 : vector<1x4xf32> to vector<4x4xf32>
    %479 = arith.mulf %477, %478 : vector<4x4xf32>
    %480 = arith.addf %474, %479 : vector<4x4xf32>
    %481 = vector.extract_strided_slice %469 {offsets = [0, 2], sizes = [4, 1], strides = [1, 1]} : vector<4x4xf32> to vector<4x1xf32>
    %482 = vector.extract_strided_slice %2 {offsets = [2, 0], sizes = [1, 4], strides = [1, 1]} : vector<4x4xf32> to vector<1x4xf32>
    %483 = vector.broadcast %481 : vector<4x1xf32> to vector<4x4xf32>
    %484 = vector.broadcast %482 : vector<1x4xf32> to vector<4x4xf32>
    %485 = arith.mulf %483, %484 : vector<4x4xf32>
    %486 = arith.addf %480, %485 : vector<4x4xf32>
    %487 = vector.extract_strided_slice %469 {offsets = [0, 3], sizes = [4, 1], strides = [1, 1]} : vector<4x4xf32> to vector<4x1xf32>
    %488 = vector.extract_strided_slice %2 {offsets = [3, 0], sizes = [1, 4], strides = [1, 1]} : vector<4x4xf32> to vector<1x4xf32>
    %489 = vector.broadcast %487 : vector<4x1xf32> to vector<4x4xf32>
    %490 = vector.broadcast %488 : vector<1x4xf32> to vector<4x4xf32>
    %491 = arith.mulf %489, %490 : vector<4x4xf32>
    %492 = arith.addf %486, %491 : vector<4x4xf32>
    %493 = vector.extract_strided_slice %469 {offsets = [3, 0], sizes = [1, 4], strides = [1, 1]} : vector<4x4xf32> to vector<1x4xf32>
    %494 = arith.mulf %0, %19 : vector<4x4xf32>
    %495 = vector.extract_strided_slice %493 {offsets = [0, 0], sizes = [1, 1], strides = [1, 1]} : vector<1x4xf32> to vector<1x1xf32>
    %496 = vector.extract_strided_slice %494 {offsets = [0, 0], sizes = [1, 4], strides = [1, 1]} : vector<4x4xf32> to vector<1x4xf32>
    %497 = vector.broadcast %495 : vector<1x1xf32> to vector<1x4xf32>
    %498 = arith.mulf %497, %496 : vector<1x4xf32>
    %499 = vector.extract_strided_slice %493 {offsets = [0, 1], sizes = [1, 1], strides = [1, 1]} : vector<1x4xf32> to vector<1x1xf32>
    %500 = vector.extract_strided_slice %494 {offsets = [1, 0], sizes = [1, 4], strides = [1, 1]} : vector<4x4xf32> to vector<1x4xf32>
    %501 = vector.broadcast %499 : vector<1x1xf32> to vector<1x4xf32>
    %502 = arith.mulf %501, %500 : vector<1x4xf32>
    %503 = arith.addf %498, %502 : vector<1x4xf32>
    %504 = vector.extract_strided_slice %493 {offsets = [0, 2], sizes = [1, 1], strides = [1, 1]} : vector<1x4xf32> to vector<1x1xf32>
    %505 = vector.extract_strided_slice %494 {offsets = [2, 0], sizes = [1, 4], strides = [1, 1]} : vector<4x4xf32> to vector<1x4xf32>
    %506 = vector.broadcast %504 : vector<1x1xf32> to vector<1x4xf32>
    %507 = arith.mulf %506, %505 : vector<1x4xf32>
    %508 = arith.addf %503, %507 : vector<1x4xf32>
    %509 = vector.extract_strided_slice %493 {offsets = [0, 3], sizes = [1, 1], strides = [1, 1]} : vector<1x4xf32> to vector<1x1xf32>
    %510 = vector.extract_strided_slice %494 {offsets = [3, 0], sizes = [1, 4], strides = [1, 1]} : vector<4x4xf32> to vector<1x4xf32>
    %511 = vector.broadcast %509 : vector<1x1xf32> to vector<1x4xf32>
    %512 = arith.mulf %511, %510 : vector<1x4xf32>
    %513 = arith.addf %508, %512 : vector<1x4xf32>
    %514 = vector.extract_strided_slice %513 {offsets = [0, 0], sizes = [1, 1], strides = [1, 1]} : vector<1x4xf32> to vector<1x1xf32>
    %515 = vector.extract_strided_slice %240 {offsets = [0, 0], sizes = [1, 4], strides = [1, 1]} : vector<4x4xf32> to vector<1x4xf32>
    %516 = vector.broadcast %514 : vector<1x1xf32> to vector<1x4xf32>
    %517 = arith.mulf %516, %515 : vector<1x4xf32>
    %518 = vector.extract_strided_slice %513 {offsets = [0, 1], sizes = [1, 1], strides = [1, 1]} : vector<1x4xf32> to vector<1x1xf32>
    %519 = vector.extract_strided_slice %240 {offsets = [1, 0], sizes = [1, 4], strides = [1, 1]} : vector<4x4xf32> to vector<1x4xf32>
    %520 = vector.broadcast %518 : vector<1x1xf32> to vector<1x4xf32>
    %521 = arith.mulf %520, %519 : vector<1x4xf32>
    %522 = arith.addf %517, %521 : vector<1x4xf32>
    %523 = vector.extract_strided_slice %513 {offsets = [0, 2], sizes = [1, 1], strides = [1, 1]} : vector<1x4xf32> to vector<1x1xf32>
    %524 = vector.extract_strided_slice %240 {offsets = [2, 0], sizes = [1, 4], strides = [1, 1]} : vector<4x4xf32> to vector<1x4xf32>
    %525 = vector.broadcast %523 : vector<1x1xf32> to vector<1x4xf32>
    %526 = arith.mulf %525, %524 : vector<1x4xf32>
    %527 = arith.addf %522, %526 : vector<1x4xf32>
    %528 = vector.extract_strided_slice %513 {offsets = [0, 3], sizes = [1, 1], strides = [1, 1]} : vector<1x4xf32> to vector<1x1xf32>
    %529 = vector.extract_strided_slice %240 {offsets = [3, 0], sizes = [1, 4], strides = [1, 1]} : vector<4x4xf32> to vector<1x4xf32>
    %530 = vector.broadcast %528 : vector<1x1xf32> to vector<1x4xf32>
    %531 = arith.mulf %530, %529 : vector<1x4xf32>
    %532 = arith.addf %527, %531 : vector<1x4xf32>
    %cst_71 = arith.constant 0.000000e+00 : f32
    %533 = vector.broadcast %cst_71 : f32 to vector<1x4xf32>
    %534 = arith.subf %533, %532 : vector<1x4xf32>
    %c0_72 = arith.constant 0 : index
    %c0_73 = arith.constant 0 : index
    %535 = vector.load %arg1[%c0_72, %c0_73] : memref<16x4xf32, #tpu.memory_space<vmem>>, vector<4x4xf32>
    tpu.vector_store %arg1[%c0_72, %c0_73], %391 {strides = array<i32>} : memref<16x4xf32, #tpu.memory_space<vmem>>, vector<4x4xf32>,
    %c4_74 = arith.constant 4 : index
    %c0_75 = arith.constant 0 : index
    %536 = vector.load %arg1[%c4_74, %c0_75] : memref<16x4xf32, #tpu.memory_space<vmem>>, vector<4x4xf32>
    tpu.vector_store %arg1[%c4_74, %c0_75], %469 {strides = array<i32>} : memref<16x4xf32, #tpu.memory_space<vmem>>, vector<4x4xf32>,
    %c8_76 = arith.constant 8 : index
    %c0_77 = arith.constant 0 : index
    %537 = vector.load %arg1[%c8_76, %c0_77] : memref<16x4xf32, #tpu.memory_space<vmem>>, vector<4x4xf32>
    tpu.vector_store %arg1[%c8_76, %c0_77], %492 {strides = array<i32>} : memref<16x4xf32, #tpu.memory_space<vmem>>, vector<4x4xf32>,
    %c12_78 = arith.constant 12 : index
    %c0_79 = arith.constant 0 : index
    %538 = vector.load %arg1[%c12_78, %c0_79] : memref<16x4xf32, #tpu.memory_space<vmem>>, vector<1x4xf32>
    tpu.vector_store %arg1[%c12_78, %c0_79], %534 {strides = array<i32>} : memref<16x4xf32, #tpu.memory_space<vmem>>, vector<1x4xf32>,
    %cst_80 = arith.constant 0.000000e+00 : f32
    %539 = vector.broadcast %cst_80 : f32 to vector<3x4xf32>
    %c13_81 = arith.constant 13 : index
    %c0_82 = arith.constant 0 : index
    %540 = vector.load %arg1[%c13_81, %c0_82] : memref<16x4xf32, #tpu.memory_space<vmem>>, vector<3x4xf32>
    tpu.vector_store %arg1[%c13_81, %c0_82], %539 {strides = array<i32>} : memref<16x4xf32, #tpu.memory_space<vmem>>, vector<3x4xf32>,
    return
  }
}

</mosaic_0001>

<bundles_post_ra>
// kernel: _camera_pose_forward.1
= control target key start
LH: loop header
LB: loop body
LE: loop exit
PB: predicated region body
PF: predicated region fallthrough
CT: control target
= control target key end

     0   :  { %s603_s8 = smov 126   ;;  %s604_s9 = smov 127   ;;  %s863_s0 = inlined_call_operand.vmem [shape: f32[16,4], index: 0, kind: input, shape index: {}]   ;;  %s864_s1 = inlined_call_operand.vmem [shape: f32[16,4], index: 1, kind: output, shape index: {}]  }
   0x1   :  { %v11_v0 = vld [vmem:[%s863_s0 + $0xc] sm:$0x1]  ;;  %v626_v3 = vld [vmem:[%s863_s0 + $0xd] sm:$0x1] }
   0x2   :  { %v118_v1 = vmul.f32 %v11_v0, %v11_v0  ;;  %v26_v2 = vsub.f32 0.0, %v11_v0  ;;  %56 = vrot.lane.b32.xlu2 %v11_v0, %s603_s8 }
   0x4   :  { %120 = vrot.lane.b32.xlu0 %v118_v1, %s604_s9  ;;  %33 = vrot.lane.b32.xlu1 %v26_v2, %s603_s8 }
   0xa   :  { %75 = vrot.lane.b32.xlu2 %v26_v2, %s604_s9 }
   0xc   :  { %124 = vrot.lane.b32.xlu0 %v118_v1, %s603_s8  ;;  %44 = vrot.lane.b32.xlu1 %v11_v0, %s604_s9 }
  0x14   :  { %233 = vrot.lane.b32.xlu0 %v626_v3, %s604_s9  ;;  %243 = vrot.lane.b32.xlu1 %v626_v3, %s603_s8 }
  0x5c   :  { %v57_v4 = vpop.permute.xlu2 %56 }
  0x64   :  { %v76_v11 = vpop.permute.xlu2 %75 }
  0x76   :  { %v121_v5 = vpop.permute.xlu0 %120  ;;  %v34_v6 = vpop.permute.xlu1 %33 }
  0x77   :  { %541 = vpush %v34_v6  ;;  %v123_v7 = vadd.f32 %v121_v5, %v118_v1 }
  0x7e   :  { %v125_v8 = vpop.permute.xlu0 %124  ;;  %v45_v9 = vpop.permute.xlu1 %44 }
  0x7f   :  { %v127_v10 = vadd.f32 %v125_v8, %v123_v7  ;;  %543 = vpush %v45_v9 }
  0x80   :  { %545 = vpush %v57_v4 }
  0x81   :  { %547 = vpush %v26_v2  ;;  %v128_v12 = vmul.f32 -0.16666667, %v127_v10  ;;  %v134_v13 = vmul.f32 %v127_v10, %v127_v10  ;;  %v130_v14 = vmul.f32 -0.041666668, %v127_v10  ;;  %v132_v15 = vmul.f32 -0.008333334, %v127_v10 }
  0x82   :  { %549 = vpush %v76_v11 }
  0x83   :  { %551 = vpush %v11_v0  ;;  %v129_v16 = vadd.f32 1.0, %v128_v12  ;;  %v135_v17 = vmul.f32 0.008333334, %v134_v13  ;;  %v141_v18 = vmul.f32 %v134_v13, %v127_v10  ;;  %v131_v19 = vadd.f32 0.5, %v130_v14 }
  0x84   :  { %v137_v20 = vmul.f32 0.0013888889, %v134_v13  ;;  %v133_v21 = vadd.f32 0.16666667, %v132_v15  ;;  %v139_v22 = vmul.f32 0.0001984127, %v134_v13 }
  0x85   :  { %v136_v23 = vadd.f32 %v135_v17, %v129_v16  ;;  %v142_v24 = vmul.f32 -0.0001984127, %v141_v18  ;;  %v148_v25 = vmul.f32 %v141_v18, %v127_v10  ;;  %v144_v26 = vmul.f32 -2.4801588e-05, %v141_v18 }
  0x86   :  { %v138_v27 = vadd.f32 %v137_v20, %v131_v19  ;;  %v140_v28 = vadd.f32 %v139_v22, %v133_v21  ;;  %v146_v29 = vmul.f32 -2.7557319e-06, %v141_v18  ;;  %v234_v19 = vpop.permute.xlu0 %233  ;;  %v244_v20 = vpop.permute.xlu1 %243  ;;  %v605_v21 = vmov 2  }
  0x87   :  { %v143_v30 = vadd.f32 %v142_v24, %v136_v23  ;;  %v149_v31 = vmul.f32 2.7557319e-06, %v148_v25  ;;  %v155_v32 = vmul.f32 %v148_v25, %v127_v10  ;;  %v151_v33 = vmul.f32 2.755732e-07, %v148_v25  ;;  %574 = vset.pattern.permute.xlu1 %v605_v21 }
  0x88   :  { %v145_v34 = vadd.f32 %v144_v26, %v138_v27  ;;  %v147_v35 = vadd.f32 %v146_v29, %v140_v28  ;;  %v153_v36 = vmul.f32 2.5052108e-08, %v148_v25  ;;  %v606_v22 = vmov 1  }
  0x89   :  { %v150_v37 = vadd.f32 %v149_v31, %v143_v30  ;;  %v156_v38 = vmul.f32 -2.5052108e-08, %v155_v32  ;;  %v162_v39 = vmul.f32 %v155_v32, %v127_v10  ;;  %v158_v40 = vmul.f32 -2.0876756e-09, %v155_v32  ;;  %573 = vset.pattern.permute.xlu0 %v606_v22 }
  0x8a   :  { %v152_v41 = vadd.f32 %v151_v33, %v145_v34  ;;  %v154_v42 = vadd.f32 %v153_v36, %v147_v35  ;;  %v160_v43 = vmul.f32 -1.6059044e-10, %v155_v32  ;;  %v607_v23 = vmov 0  }
  0x8b   :  { %v157_v44 = vadd.f32 %v156_v38, %v150_v37  ;;  %v163_v45 = vmul.f32 1.6059044e-10, %v162_v39  ;;  %v169_v46 = vmul.f32 %v162_v39, %v127_v10  ;;  %v165_v47 = vmul.f32 1.1470745e-11, %v162_v39  ;;  %572 = vset.pattern.permute.xlu2 %v607_v23 }
  0x8c   :  { %v159_v48 = vadd.f32 %v158_v40, %v152_v41  ;;  %v161_v49 = vadd.f32 %v160_v43, %v154_v42  ;;  %v167_v50 = vmul.f32 7.6471636e-13, %v162_v39  ;;  %v608_v27 = vmov 0.0  }
  0x8d   :  { %v164_v51 = vadd.f32 %v163_v45, %v157_v44  ;;  %v170_v52 = vmul.f32 -7.6471636e-13, %v169_v46  ;;  %v176_v53 = vmul.f32 %v169_v46, %v127_v10  ;;  %v172_v54 = vmul.f32 -4.7794773e-14, %v169_v46 }
  0x8e   :  { %v166_v55 = vadd.f32 %v165_v47, %v159_v48  ;;  %v168_v56 = vadd.f32 %v167_v50, %v161_v49  ;;  %v174_v57 = vmul.f32 -2.8114574e-15, %v169_v46 }
  0x8f   :  { %v171_v58 = vadd.f32 %v170_v52, %v164_v51  ;;  %v177_v59 = vmul.f32 2.8114574e-15, %v176_v53  ;;  %v183_v60 = vmul.f32 %v176_v53, %v127_v10  ;;  %v179_v61 = vmul.f32 1.5619207e-16, %v176_v53 }
  0x90   :  { %v173_v62 = vadd.f32 %v172_v54, %v166_v55  ;;  %v175_v63 = vadd.f32 %v174_v57, %v168_v56  ;;  %v181_v0 = vmul.f32 8.220635e-18, %v176_v53  ;;  %v609_v54 = vmov 3  }
  0x91   :  { %v178_v1 = vadd.f32 %v177_v59, %v171_v58  ;;  %v184_v2 = vmul.f32 -8.220635e-18, %v183_v60  ;;  %v190_v4 = vmul.f32 %v183_v60, %v127_v10  ;;  %v186_v5 = vmul.f32 -4.1103176e-19, %v183_v60 }
  0x92   :  { %v180_v6 = vadd.f32 %v179_v61, %v173_v62  ;;  %v182_v7 = vadd.f32 %v181_v0, %v175_v63  ;;  %v188_v8 = vmul.f32 -1.9572942e-20, %v183_v60  ;;  %v13_v10 = vlaneseq }
  0x93   :  { %v185_v9 = vadd.f32 %v184_v2, %v178_v1  ;;  %v191_v11 = vmul.f32 1.9572942e-20, %v190_v4  ;;  %v193_v12 = vmul.f32 8.896791e-22, %v190_v4  ;;  %v195_v13 = vmul.f32 3.8681703e-23, %v190_v4 }
  0x94   :  { %v187_v14 = vadd.f32 %v186_v5, %v180_v6  ;;  %v189_v15 = vadd.f32 %v188_v8, %v182_v7  ;;  %v634_v24 = vshrl.u32 %v13_v10, 7  ;;  %v636_v25 = vand.u32 127, %v13_v10 }
  0x95   :  { %v192_v16 = vadd.f32 %v191_v11, %v185_v9 }
  0x96   :  { %v194_v17 = vadd.f32 %v193_v12, %v187_v14  ;;  %v196_v18 = vadd.f32 %v195_v13, %v189_v15  ;;  %vm27_vm0 = vcmp.eq.s32.totalorder %v634_v24, 0  ;;  %vm28_vm1 = vcmp.eq.s32.totalorder %v636_v25, 1 }
  0x97   :  { %553 = vpush %v192_v16  ;;  %vm29_vm2 = vmand %vm27_vm0, %vm28_vm1  ;;  %vm17_vm3 = vcmp.eq.s32.totalorder %v634_v24, %v636_v25  ;;  %vm18_vm4 = vcmp.lt.s32.totalorder %v634_v24, 3  ;;  %vm22_vm5 = vcmp.lt.s32.totalorder %v636_v25, 3  ;;  %vm39_vm6 = vcmp.eq.s32.totalorder %v636_v25, 2 }
  0x98   :  { %555 = vpush %v194_v17  ;;  %vm649_vm7 = vmand %vm17_vm3, %vm18_vm4  ;;  %vm51_vm8 = vcmp.eq.s32.totalorder %v634_v24, 1  ;;  %vm52_vm9 = vcmp.eq.s32.totalorder %v636_v25, 0  ;;  %v528_v28 = vsel %vm29_vm2, 1.0, %v608_v27  ;;  %vm71_vm13 = vcmp.eq.s32.totalorder %v634_v24, 2 }
  0x99   :  { %557 = vpush %v196_v18  ;;  %vm655_vm10 = vmand %vm18_vm4, %vm22_vm5  ;;  %vm221_vm3 = vcmp.eq.s32.totalorder %v636_v25, 3  ;;  %vm250_vm4 = vcmp.eq.s32.totalorder %v634_v24, 3  ;;  %v736_v56 = vsel %vm649_vm7, 1.0, %v608_v27  ;;  %vm514_vm7 = vcmask 27648  }
  0x9a   :  { %559 = vpush %v626_v3  ;;  %vm40_vm11 = vmand %vm27_vm0, %vm39_vm6 }
  0x9b   :  { %561 = vpush %v234_v19  ;;  %vm53_vm12 = vmand %vm51_vm8, %vm52_vm9  ;;  %v529_v30 = vsel %vm40_vm11, 1.0, %v608_v27 }
  0x9c   :  { %563 = vpush %v244_v20  ;;  %vm63_vm14 = vmand %vm51_vm8, %vm39_vm6  ;;  %v530_v32 = vsel %vm53_vm12, 1.0, %v608_v27 }
  0x9d   :  { %vm72_vm15 = vmand %vm71_vm13, %vm52_vm9  ;;  %v531_v34 = vsel %vm63_vm14, 1.0, %v608_v27 }
  0x9e   :  { %vm82_vm2 = vmand %vm71_vm13, %vm28_vm1  ;;  %v532_v39 = vsel %vm72_vm15, 1.0, %v608_v27 }
  0x9f   :  { %v533_v43 = vsel %vm82_vm2, 1.0, %v608_v27  ;;  %vm697_vm5 = vmand %vm27_vm0, %vm221_vm3 }
  0xa0   :  { %vm705_vm11 = vmand %vm250_vm4, %vm52_vm9  ;;  %v534_v60 = vsel %vm697_vm5, 1.0, %v608_v27  ;;  %vm520_vm9 = vcmask 26624  }
  0xa1   :  { %vm713_vm12 = vmand %vm51_vm8, %vm221_vm3  ;;  %v537_v61 = vsel %vm705_vm11, 1.0, %v608_v27  ;;  %521 = vst.msk [vmem:[%s864_s1 + $0xd] sm:$0x7] %vm520_vm9, %v608_v27 }
  0xa2   :  { %vm724_vm0 = vmand %vm250_vm4, %vm28_vm1  ;;  %v535_v63 = vsel %vm713_vm12, 1.0, %v608_v27 }
  0xa3   :  { %vm240_vm8 = vmand %vm71_vm13, %vm221_vm3  ;;  %v538_v0 = vsel %vm724_vm0, 1.0, %v608_v27 }
  0xa4   :  { %vm260_vm1 = vmand %vm250_vm4, %vm39_vm6  ;;  %v536_v1 = vsel %vm240_vm8, 1.0, %v608_v27 }
  0xa5   :  { %v539_v6 = vsel %vm260_vm1, 1.0, %v608_v27  ;;  %vm322_vm6 = vmand %vm250_vm4, %vm221_vm3 }
  0xa8   :  { %s542_s12 = spop %541 }
  0xa9   :  { %v36_v29 = vstv %s542_s12 }
  0xaa   :  { %v38_v31 = vmul.f32 %v528_v28, %v36_v29 }
  0xb0   :  { %s544_s13 = spop %543 }
  0xb1   :  { %v47_v33 = vstv %s544_s13  ;;  %s546_s14 = spop %545 }
  0xb2   :  { %v49_v35 = vmul.f32 %v529_v30, %v47_v33  ;;  %v59_v36 = vstv %s546_s14  ;;  %s548_s15 = spop %547 }
  0xb3   :  { %v61_v37 = vmul.f32 %v530_v32, %v59_v36  ;;  %v67_v38 = vstv %s548_s15  ;;  %s550_s16 = spop %549 }
  0xb4   :  { %v50_v40 = vadd.f32 %v49_v35, %v38_v31  ;;  %v69_v41 = vmul.f32 %v531_v34, %v67_v38  ;;  %v78_v42 = vstv %s550_s16  ;;  %s552_s17 = spop %551 }
  0xb5   :  { %v86_v44 = vstv %s552_s17  ;;  %v80_v46 = vmul.f32 %v532_v39, %v78_v42 }
  0xb6   :  { %v62_v45 = vadd.f32 %v61_v37, %v50_v40  ;;  %v88_v48 = vmul.f32 %v533_v43, %v86_v44 }
  0xb8   :  { %v70_v47 = vadd.f32 %v69_v41, %v62_v45 }
  0xba   :  { %v81_v49 = vadd.f32 %v80_v46, %v70_v47 }
  0xbc   :  { %v686_v50 = vadd.f32 %v88_v48, %v81_v49 }
  0xbe   :  { %105 = vperm.xlu1 %574, %v686_v50   ;;  %98 = vperm.xlu0 %573, %v686_v50   ;;  %v95_v28 = vperm.slane %v686_v50, 0  ;;  %v101_v29 = vperm.slane %v686_v50, 1  ;;  %v108_v34 = vperm.slane %v686_v50, 2  ;;  %v115_v36 = vperm.slane %v686_v50, 3 }
  0xbf   :  { %92 = vperm.xlu2 %572, %v686_v50  }
  0xc6   :  { %576 = vset.pattern.permute.xlu1 %v607_v23  ;;  %578 = vset.pattern.permute.xlu0 %v605_v21 }
  0xc7   :  { %575 = vset.pattern.permute.xlu2 %v609_v54 }
  0xc8   :  { %112 = vperm.xlu2 %575, %v686_v50   ;;  %s554_s18 = spop %553 }
  0xc9   :  { %v199_v57 = vstv %s554_s18  ;;  %s738_s19 = spop %555 }
  0xca   :  { %v201_v58 = vmul.f32 %v199_v57, %v686_v50  ;;  %v205_v59 = vstv %s738_s19  ;;  %s746_s20 = spop %557 }
  0xcb   :  { %v211_v62 = vmul.f32 %v205_v59, %v686_v50  ;;  %s560_s21 = spop %559  ;;  %v215_v42 = vstv %s746_s20 }
  0xcc   :  { %v202_v2 = vadd.f32 %v736_v56, %v201_v58  ;;  %v209_v4 = vsub.f32 %v736_v56, %v201_v58  ;;  %v227_v5 = vstv %s560_s21  ;;  %s562_s22 = spop %561 }
  0xcd   :  { %v212_v7 = vadd.f32 %v736_v56, %v211_v62  ;;  %v219_v8 = vsub.f32 %v736_v56, %v211_v62  ;;  %v229_v9 = vmul.f32 %v534_v60, %v227_v5  ;;  %v254_v11 = vmul.f32 %v537_v61, %v227_v5  ;;  %s564_s23 = spop %563 }
  0xce   :  { %v236_v12 = vstv %s562_s22  ;;  %v246_v13 = vstv %s564_s23 }
  0xcf   :  { %v238_v14 = vmul.f32 %v535_v63, %v236_v12  ;;  %v258_v15 = vmul.f32 %v538_v0, %v236_v12  ;;  %v248_v16 = vmul.f32 %v536_v1, %v246_v13  ;;  %v263_v17 = vmul.f32 %v539_v6, %v246_v13 }
  0xd0   :  { %577 = vset.pattern.permute.xlu2 %v606_v22 }
  0xd1   :  { %v239_v18 = vadd.f32 %v238_v14, %v229_v9  ;;  %v259_v19 = vadd.f32 %v258_v15, %v254_v11 }
  0xd3   :  { %v768_v20 = vadd.f32 %v248_v16, %v239_v18  ;;  %v264_v10 = vadd.f32 %v263_v17, %v259_v19  ;;  %v793_v18 = vsel %vm322_vm6, 1.0, %v608_v27 }
  0xd5   :  { %369 = vperm.xlu0 %578, %v264_v10   ;;  %362 = vperm.xlu2 %577, %v264_v10  }
  0xd6   :  { %356 = vperm.xlu1 %576, %v264_v10  }
  0xdd   :  { %583 = vset.pattern.permute.xlu0 %v609_v54  ;;  %580 = vset.pattern.permute.xlu2 %v607_v23 }
  0xde   :  { %579 = vset.pattern.permute.xlu1 %v609_v54 }
  0xdf   :  { %376 = vperm.xlu1 %579, %v264_v10  }
  0xe7   :  { %581 = vset.pattern.permute.xlu1 %v606_v22 }
 0x119   :  { %v93_v3 = vpop.permute.xlu2 %92 }
 0x11a   :  { %v96_v32 = vmul.f32 %v95_v28, %v93_v3  ;;  %v9_v3 = vld [vmem:[%s863_s0 + $0x4] sm:$0xf] }
 0x11b   :  { %v417_v28 = vperm.slane %v9_v3, 0 }
 0x122   :  { %v113_v35 = vpop.permute.xlu2 %112 }
 0x123   :  { %v116_v39 = vmul.f32 %v115_v36, %v113_v35 }
 0x12f   :  { %v363_v55 = vpop.permute.xlu2 %362 }
 0x130   :  { %v99_v30 = vpop.permute.xlu0 %98  ;;  %v106_v31 = vpop.permute.xlu1 %105 }
 0x131   :  { %v102_v33 = vmul.f32 %v101_v29, %v99_v30  ;;  %v109_v38 = vmul.f32 %v108_v34, %v106_v31  ;;  %v423_v29 = vperm.slane %v9_v3, 1  ;;  %v430_v30 = vperm.slane %v9_v3, 2 }
 0x132   :  { %v437_v34 = vperm.slane %v9_v3, 3 }
 0x133   :  { %v103_v37 = vadd.f32 %v102_v33, %v96_v32 }
 0x135   :  { %v110_v40 = vadd.f32 %v109_v38, %v103_v37 }
 0x137   :  { %v117_v41 = vadd.f32 %v116_v39, %v110_v40 }
 0x139   :  { %v207_v43 = vmul.f32 %v205_v59, %v117_v41  ;;  %v217_v44 = vmul.f32 %v215_v42, %v117_v41  ;;  %v8_v42 = vld [vmem:[%s863_s0] sm:$0xf] }
 0x13b   :  { %v208_v45 = vadd.f32 %v207_v43, %v202_v2  ;;  %v779_v46 = vadd.f32 %v209_v4, %v207_v43  ;;  %v220_v47 = vadd.f32 %v219_v8, %v217_v44  ;;  %v781_v48 = vadd.f32 %v217_v44, %v212_v7 }
 0x13c   :  { %v527_v44 = vsel %vm655_vm10, 1.0, %v608_v27  ;;  %vm518_vm10 = vcmask 27651  }
 0x13d   :  { %v359_v49 = vperm.slane %v220_v47, 0  ;;  %v365_v51 = vperm.slane %v220_v47, 1  ;;  %v372_v57 = vperm.slane %v220_v47, 2  ;;  %v379_v61 = vperm.slane %v220_v47, 3 }
 0x13e   :  { %v387_v2 = vperm.slane %v208_v45, 0  ;;  %v393_v4 = vperm.slane %v208_v45, 1  ;;  %v400_v8 = vperm.slane %v208_v45, 2  ;;  %v407_v13 = vperm.slane %v208_v45, 3 }
 0x13f   :  { %v366_v50 = vmul.f32 %v365_v51, %v363_v55  ;;  %v468_v47 = vmul.f32 %v527_v44, %v8_v42 }
 0x141   :  { %v473_v51 = vrot.slane %v468_v47, 6 }
 0x147   :  { %v370_v56 = vpop.permute.xlu0 %369 }
 0x148   :  { %v357_v52 = vpop.permute.xlu1 %356  ;;  %v373_v60 = vmul.f32 %v372_v57, %v370_v56 }
 0x149   :  { %v360_v53 = vmul.f32 %v359_v49, %v357_v52 }
 0x14b   :  { %v367_v58 = vadd.f32 %v366_v50, %v360_v53 }
 0x14d   :  { %v374_v59 = vadd.f32 %v373_v60, %v367_v58  ;;  %v477_v60 = vrot.slane %v468_v47, 7 }
 0x151   :  { %v377_v62 = vpop.permute.xlu1 %376 }
 0x152   :  { %v380_v63 = vmul.f32 %v379_v61, %v377_v62 }
 0x154   :  { %v381_v0 = vadd.f32 %v380_v63, %v374_v59 }
 0x156   :  { %404 = vperm.xlu0 %583, %v381_v0   ;;  %390 = vperm.xlu1 %581, %v381_v0  }
 0x157   :  { %384 = vperm.xlu2 %580, %v381_v0  }
 0x15e   :  { %584 = vset.pattern.permute.xlu1 %v607_v23 }
 0x15f   :  { %582 = vset.pattern.permute.xlu2 %v605_v21  ;;  %267 = vperm.xlu1 %584, %v781_v48  }
 0x160   :  { %397 = vperm.xlu2 %582, %v381_v0  }
 0x167   :  { %586 = vset.pattern.permute.xlu1 %v606_v22 }
 0x168   :  { %585 = vset.pattern.permute.xlu2 %v607_v23 }
 0x1b1   :  { %v385_v1 = vpop.permute.xlu2 %384 }
 0x1b2   :  { %v388_v7 = vmul.f32 %v387_v2, %v385_v1 }
 0x1ba   :  { %v398_v5 = vpop.permute.xlu2 %397 }
 0x1bb   :  { %v401_v12 = vmul.f32 %v400_v8, %v398_v5 }
 0x1c8   :  { %v391_v6 = vpop.permute.xlu1 %390  ;;  %v405_v11 = vpop.permute.xlu0 %404 }
 0x1c9   :  { %v394_v9 = vmul.f32 %v393_v4, %v391_v6  ;;  %v408_v15 = vmul.f32 %v407_v13, %v405_v11  ;;  %v270_v11 = vperm.slane %v768_v20, 0 }
 0x1cb   :  { %v395_v14 = vadd.f32 %v394_v9, %v388_v7  ;;  %v276_v9 = vperm.slane %v768_v20, 1 }
 0x1cd   :  { %v402_v16 = vadd.f32 %v401_v12, %v395_v14 }
 0x1cf   :  { %v409_v17 = vadd.f32 %v408_v15, %v402_v16  ;;  %v283_v15 = vperm.slane %v768_v20, 2 }
 0x1d1   :  { %v410_v19 = vsub.f32 %v208_v45, %v409_v17  ;;  %v802_v25 = vpop.permute.xlu1 %267  ;;  %v290_v17 = vperm.slane %v768_v20, 3 }
 0x1d2   :  { %v271_v13 = vmul.f32 %v270_v11, %v802_v25 }
 0x1d3   :  { %v411_v10 = vadd.f32 %v793_v18, %v410_v19 }
 0x1d5   :  { %434 = vperm.xlu0 %583, %v411_v10   ;;  %420 = vperm.xlu1 %586, %v411_v10  }
 0x1d6   :  { %414 = vperm.xlu2 %585, %v411_v10  }
 0x1dd   :  { %273 = vperm.xlu1 %586, %v781_v48   ;;  %590 = vset.pattern.permute.xlu0 %v605_v21 }
 0x1de   :  { %587 = vset.pattern.permute.xlu2 %v605_v21 }
 0x1df   :  { %427 = vperm.xlu2 %587, %v411_v10  }
 0x1e5   :  { %588 = vset.pattern.permute.xlu1 %v607_v23 }
 0x1e7   :  { %280 = vperm.xlu2 %587, %v781_v48  }
 0x1ef   :  { %589 = vset.pattern.permute.xlu2 %v606_v22 }
 0x230   :  { %v415_v24 = vpop.permute.xlu2 %414 }
 0x231   :  { %v418_v33 = vmul.f32 %v417_v28, %v415_v24 }
 0x239   :  { %v428_v31 = vpop.permute.xlu2 %427 }
 0x23a   :  { %v431_v37 = vmul.f32 %v430_v30, %v428_v31 }
 0x241   :  { %v281_v45 = vpop.permute.xlu2 %280 }
 0x247   :  { %v421_v32 = vpop.permute.xlu1 %420  ;;  %v435_v36 = vpop.permute.xlu0 %434 }
 0x248   :  { %v424_v35 = vmul.f32 %v423_v29, %v421_v32  ;;  %v438_v39 = vmul.f32 %v437_v34, %v435_v36 }
 0x24a   :  { %v425_v38 = vadd.f32 %v424_v35, %v418_v33 }
 0x24c   :  { %v432_v40 = vadd.f32 %v431_v37, %v425_v38 }
 0x24e   :  { %v439_v41 = vadd.f32 %v438_v39, %v432_v40 }
 0x24f   :  { %v274_v43 = vpop.permute.xlu1 %273 }
 0x250   :  { %455 = vperm.xlu0 %590, %v439_v41   ;;  %448 = vperm.xlu2 %589, %v439_v41   ;;  %516 = vst.msk [vmem:[%s864_s1 + $0x4] sm:$0xf] %vm514_vm7, %v439_v41  ;;  %v277_v12 = vmul.f32 %v276_v9, %v274_v43 }
 0x251   :  { %442 = vperm.xlu1 %588, %v439_v41  }
 0x252   :  { %v278_v16 = vadd.f32 %v277_v12, %v271_v13 }
 0x258   :  { %591 = vset.pattern.permute.xlu0 %v609_v54  ;;  %593 = vset.pattern.permute.xlu2 %v607_v23 }
 0x259   :  { %592 = vset.pattern.permute.xlu1 %v609_v54  ;;  %287 = vperm.xlu0 %591, %v781_v48   ;;  %v470_v48 = vrot.slane %v468_v47, 5 }
 0x25a   :  { %295 = vperm.xlu2 %593, %v779_v46   ;;  %462 = vperm.xlu1 %592, %v439_v41   ;;  %v495_v41 = vrot.slane %v779_v46, 6 }
 0x261   :  { %315 = vperm.xlu0 %591, %v779_v46  }
 0x262   :  { %595 = vset.pattern.permute.xlu2 %v605_v21  ;;  %594 = vset.pattern.permute.xlu1 %v606_v22 }
 0x263   :  { %308 = vperm.xlu2 %595, %v779_v46   ;;  %301 = vperm.xlu1 %594, %v779_v46  }
 0x269   :  { %598 = vset.pattern.permute.xlu0 %v605_v21 }
 0x26b   :  { %596 = vset.pattern.permute.xlu1 %v607_v23  ;;  %597 = vset.pattern.permute.xlu2 %v606_v22  ;;  %v10_v23 = vld [vmem:[%s863_s0 + $0x8] sm:$0xf] }
 0x26c   :  { %328 = vperm.xlu1 %596, %v8_v42   ;;  %334 = vperm.xlu2 %597, %v8_v42   ;;  %v445_v22 = vperm.slane %v10_v23, 0  ;;  %v451_v49 = vperm.slane %v10_v23, 1  ;;  %v458_v58 = vperm.slane %v10_v23, 2  ;;  %v465_v62 = vperm.slane %v10_v23, 3 }
 0x26d   :  { %v503_v23 = vrot.slane %v779_v46, 7 }
 0x2aa   :  { %v449_v53 = vpop.permute.xlu2 %448 }
 0x2ab   :  { %v452_v56 = vmul.f32 %v451_v49, %v449_v53  ;;  %v475_v57 = vmul.f32 %v473_v51, %v449_v53 }
 0x2b4   :  { %v296_v8 = vpop.permute.xlu2 %295 }
 0x2bd   :  { %v309_v10 = vpop.permute.xlu2 %308 }
 0x2c2   :  { %v456_v26 = vpop.permute.xlu0 %455 }
 0x2c3   :  { %v443_v52 = vpop.permute.xlu1 %442  ;;  %v459_v59 = vmul.f32 %v458_v58, %v456_v26  ;;  %v479_v63 = vmul.f32 %v477_v60, %v456_v26 }
 0x2c4   :  { %v446_v55 = vmul.f32 %v445_v22, %v443_v52  ;;  %v472_v50 = vmul.f32 %v470_v48, %v443_v52 }
 0x2c6   :  { %v453_v27 = vadd.f32 %v452_v56, %v446_v55  ;;  %v476_v61 = vadd.f32 %v475_v57, %v472_v50  ;;  %v335_v30 = vpop.permute.xlu2 %334 }
 0x2c8   :  { %v460_v1 = vadd.f32 %v459_v59, %v453_v27  ;;  %v480_v4 = vadd.f32 %v479_v63, %v476_v61 }
 0x2cb   :  { %v288_v14 = vpop.permute.xlu0 %287 }
 0x2cc   :  { %v463_v0 = vpop.permute.xlu1 %462  ;;  %v291_v19 = vmul.f32 %v290_v17, %v288_v14 }
 0x2cd   :  { %v466_v2 = vmul.f32 %v465_v62, %v463_v0  ;;  %v481_v5 = vmul.f32 %v468_v47, %v463_v0 }
 0x2cf   :  { %v467_v6 = vadd.f32 %v466_v2, %v460_v1  ;;  %v482_v7 = vadd.f32 %v481_v5, %v480_v4 }
 0x2d1   :  { %517 = vst.msk [vmem:[%s864_s1 + $0x8] sm:$0xf] %vm514_vm7, %v467_v6  ;;  %500 = vperm.xlu0 %598, %v482_v7   ;;  %492 = vperm.xlu2 %597, %v482_v7  }
 0x2d2   :  { %485 = vperm.xlu1 %596, %v482_v7  }
 0x2d3   :  { %v316_v25 = vpop.permute.xlu0 %315 }
 0x2d5   :  { %v302_v3 = vpop.permute.xlu1 %301 }
 0x2d9   :  { %600 = vset.pattern.permute.xlu2 %v609_v54  ;;  %602 = vset.pattern.permute.xlu0 %v609_v54 }
 0x2da   :  { %599 = vset.pattern.permute.xlu1 %v605_v21  ;;  %508 = vperm.xlu2 %600, %v482_v7   ;;  %v284_v21 = vmul.f32 %v283_v15, %v281_v45 }
 0x2db   :  { %341 = vperm.xlu1 %599, %v8_v42  }
 0x2dc   :  { %v285_v24 = vadd.f32 %v284_v21, %v278_v16 }
 0x2de   :  { %v329_v36 = vpop.permute.xlu1 %328 }
 0x2e3   :  { %601 = vset.pattern.permute.xlu1 %v609_v54  ;;  %v292_v54 = vadd.f32 %v291_v19, %v285_v24 }
 0x2e4   :  { %348 = vperm.xlu1 %601, %v8_v42   ;;  %v488_v42 = vrot.slane %v779_v46, 5 }
 0x2e5   :  { %v298_v28 = vperm.slane %v292_v54, 0  ;;  %v304_v29 = vperm.slane %v292_v54, 1  ;;  %v311_v33 = vperm.slane %v292_v54, 2  ;;  %v318_v38 = vperm.slane %v292_v54, 3 }
 0x2e7   :  { %v305_v31 = vmul.f32 %v304_v29, %v302_v3  ;;  %v299_v32 = vmul.f32 %v298_v28, %v296_v8  ;;  %v312_v35 = vmul.f32 %v311_v33, %v309_v10  ;;  %v319_v20 = vmul.f32 %v318_v38, %v316_v25 }
 0x2e9   :  { %v306_v34 = vadd.f32 %v305_v31, %v299_v32 }
 0x2eb   :  { %v313_v39 = vadd.f32 %v312_v35, %v306_v34 }
 0x2ed   :  { %v320_v40 = vadd.f32 %v319_v20, %v313_v39 }
 0x2ef   :  { %v321_v45 = vsub.f32 %v779_v46, %v320_v40 }
 0x2f1   :  { %v325_v52 = vadd.f32 %v793_v18, %v321_v45 }
 0x2f3   :  { %v337_v56 = vperm.slane %v325_v52, 1  ;;  %v331_v57 = vperm.slane %v325_v52, 0  ;;  %v344_v61 = vperm.slane %v325_v52, 2  ;;  %v351_v63 = vperm.slane %v325_v52, 3 }
 0x2f5   :  { %v338_v26 = vmul.f32 %v337_v56, %v335_v30  ;;  %v332_v27 = vmul.f32 %v331_v57, %v329_v36 }
 0x2f7   :  { %v339_v59 = vadd.f32 %v338_v26, %v332_v27 }
 0x32b   :  { %v493_v37 = vpop.permute.xlu2 %492 }
 0x32c   :  { %v497_v47 = vmul.f32 %v495_v41, %v493_v37 }
 0x334   :  { %v509_v48 = vpop.permute.xlu2 %508 }
 0x335   :  { %v511_v53 = vmul.f32 %v509_v48, %v779_v46 }
 0x343   :  { %v501_v43 = vpop.permute.xlu0 %500 }
 0x344   :  { %v486_v44 = vpop.permute.xlu1 %485  ;;  %v505_v49 = vmul.f32 %v503_v23, %v501_v43 }
 0x345   :  { %v490_v22 = vmul.f32 %v488_v42, %v486_v44 }
 0x347   :  { %v498_v51 = vadd.f32 %v497_v47, %v490_v22 }
 0x349   :  { %v506_v55 = vadd.f32 %v505_v49, %v498_v51 }
 0x34b   :  { %v512_v50 = vadd.f32 %v511_v53, %v506_v55 }
 0x34d   :  { %v513_v58 = vsub.f32 0.0, %v512_v50  ;;  %v342_v60 = vpop.permute.xlu1 %341 }
 0x34e   :  { %v345_v62 = vmul.f32 %v344_v61, %v342_v60 }
 0x34f   :  { %519 = vst.msk [vmem:[%s864_s1 + $0x9] sm:$0x8] %vm518_vm10, %v513_v58 }
 0x350   :  { %v346_v0 = vadd.f32 %v345_v62, %v339_v59 }
 0x356   :  { %v349_v18 = vpop.permute.xlu1 %348 }
 0x357   :  { %v352_v46 = vmul.f32 %v351_v63, %v349_v18 }
 0x359   :  { %v353_v1 = vadd.f32 %v352_v46, %v346_v0 }
 0x35b   :  { %515 = vst.msk [vmem:[%s864_s1] sm:$0xf] %vm514_vm7, %v353_v1 }

</bundles_post_ra>
